<compile_context>
chip_gen: v7x
topology: tpu7x:2x2x1
jax: 0.10.0
libtpu: 0.0.40
codegen_flags: <defaults>
</compile_context>

<pallas_src>
import jax
import jax.numpy as jnp
from jax.experimental import pallas as pl
from jax.experimental.pallas import tpu as pltpu

FEATURE_DIM = 1280        # efficientnet_b0 classifier[1].in_features
STEM_COUT = 32
KSIZE = 3
STRIDE = 2
PATCH_K = KSIZE * KSIZE * 3   # 27 = 3x3 taps x 3 input channels
HID1 = 512
HID2 = 128
MAX_SPATIAL_TILE = 16384      # lanes per grid step (see VMEM budget above)


def _ceil_div(a, b):
    return -(-a // b)


# ----------------------------- Pallas kernel ------------------------------- #

def _make_fused_kernel(inv_p, num_pad):
    """Fused stem-conv + GAP + classifier kernel.

    inv_p   = 1 / (OH*OW)  (mean over REAL spatial positions)
    num_pad = number of zero-padded spatial columns appended to reach the tile
              multiple; each contributes SiLU(bias) per channel to the running
              sum and is removed in closed form before the mean.
    """

    def kernel(pat_ref, wc_ref, bias_ref,
               w1_ref, b1_ref, w2_ref, b2_ref, w3_ref, b3_ref,
               o_ref, acc_ref):
        s = pl.program_id(1)

        @pl.when(s == 0)
        def _():
            acc_ref[...] = jnp.zeros_like(acc_ref)

        # Stem conv as a single K=27 contraction (im2col done in the wrapper,
        # bf16, BN scale pre-folded into wc); spatial axis lane-dense.
        y = jnp.dot(wc_ref[...], pat_ref[0],
                    preferred_element_type=jnp.float32)      # [32, pt] f32
        y = y + bias_ref[...]                                 # folded-BN bias
        y = y * (0.5 * (jnp.tanh(0.5 * y) + 1.0))             # SiLU (stable)

        # Running per-channel sum for the global average pool.
        acc_ref[...] += jnp.sum(y, axis=1, keepdims=True)     # [32, 1]

        # Last spatial tile for this sample: finish GAP, run the MLP head.
        @pl.when(s == pl.num_programs(1) - 1)
        def _():
            acc = acc_ref[...]
            if num_pad:
                # Zero-padded patch columns each contributed SiLU(bias);
                # subtract them so the mean covers real positions only.
                b = bias_ref[...]
                acc = acc - num_pad * (b * (0.5 * (jnp.tanh(0.5 * b) + 1.0)))
            pooled = (acc * inv_p).astype(jnp.bfloat16)       # [32, 1]
            # proj(32->1280) folded into fc1 -> single [512, 32] matrix.
            h = jnp.dot(w1_ref[...], pooled,
                        preferred_element_type=jnp.float32) + b1_ref[...]
            h = jnp.maximum(h, 0.0)                   # ReLU; Dropout = identity
            h = jnp.dot(w2_ref[...], h.astype(jnp.bfloat16),
                        preferred_element_type=jnp.float32) + b2_ref[...]
            h = jnp.maximum(h, 0.0)
            logit = jnp.dot(w3_ref[...], h.astype(jnp.bfloat16),
                            preferred_element_type=jnp.float32) + b3_ref[...]
            o_ref[...] = logit.reshape(o_ref.shape)

    return kernel


# ------------------------------ wrapper ------------------------------------ #

def _spatial_tiling(p):
    """Return (tile, n_tiles, padded_p).

    tile is a multiple of 128 (lane aligned), at most ~MAX_SPATIAL_TILE, and
    chosen to minimize padding waste; p is padded up to tile * n_tiles (the
    kernel corrects for the padded zero columns in closed form)."""
    n_sp = max(1, _ceil_div(p, MAX_SPATIAL_TILE))
    pt = _ceil_div(_ceil_div(p, n_sp), 128) * 128
    return pt, n_sp, pt * n_sp


def _extract_patches_nchw(x_nchw):
    """3x3 / stride-2 / pad-1 im2col directly from NCHW -> [N, 27, OH*OW].

    No NCHW->NHWC or channel transposes: taps are [N,3,OH,OW] slices stacked on
    axis=1, so a plain reshape yields k-order (kh, kw, cin) with the spatial
    axis lane-dense.
    """
    n, _, h, w = x_nchw.shape
    oh = (h + 2 - KSIZE) // STRIDE + 1
    ow = (w + 2 - KSIZE) // STRIDE + 1
    xp = jnp.pad(x_nchw, ((0, 0), (0, 0), (1, 1), (1, 1)))
    taps = [xp[:, :, kh:kh + STRIDE * oh:STRIDE, kw:kw + STRIDE * ow:STRIDE]
            for kh in range(KSIZE) for kw in range(KSIZE)]
    pat = jnp.stack(taps, axis=1)                 # [N, 9, 3, OH, OW]
    return pat.reshape(n, PATCH_K, oh * ow), oh, ow


def deepfake_cnn_forward(x_nchw, params):
    """Forward pass matching DeepfakeCNN.forward (eval mode).

    x_nchw: [N, 3, H, W] float32 (NCHW, like PyTorch), or [N, T, 3, H, W]
            in which case frame 0 is used (matching x[:, 0]).
    Returns logits of shape [N, 1].
    """
    if x_nchw.ndim == 5:
        x_nchw = x_nchw[:, 0]
    elif x_nchw.ndim != 4:
        raise ValueError(f"Unsupported input shape: {x_nchw.shape}")

    n = x_nchw.shape[0]
    # bf16 patches: halves both the wrapper's pat write and the kernel's pat
    # DMA (the dominant HBM traffic); the MXU contraction runs in bf16 anyway.
    pat, oh, ow = _extract_patches_nchw(x_nchw.astype(jnp.bfloat16))
    p_total = oh * ow
    pt, n_sp, p_pad = _spatial_tiling(p_total)
    if p_pad != p_total:
        pat = jnp.pad(pat, ((0, 0), (0, 0), (0, p_pad - p_total)))

    # ---- one-time parameter prep (plain JAX, constant-folded under jit) ----
    # conv weight [3,3,3,32] -> [32,27] matching the (kh,kw,cin) patch order,
    # with the folded-BatchNorm scale baked in (exact in f32).
    wc = jnp.transpose(params["stem_w"], (3, 0, 1, 2)).reshape(STEM_COUT, PATCH_K)
    wc = (params["stem_scale"].reshape(STEM_COUT, 1) * wc).astype(jnp.bfloat16)
    bias = params["stem_bias"].reshape(STEM_COUT, 1)               # f32
    # Fold proj (32->1280) into fc1 (1280->512): exact in f32 (no nonlinearity
    # in between); cast the fused matrix to bf16 afterwards.
    w1f = params["proj_w"] @ params["fc1_w"]                       # [32, 512]
    b1f = params["proj_b"] @ params["fc1_w"] + params["fc1_b"]     # [1, 512]
    w1t = w1f.T.astype(jnp.bfloat16)                               # [512, 32]
    b1t = b1f.T                                                    # [512, 1]
    w2t = params["fc2_w"].T.astype(jnp.bfloat16)                   # [128, 512]
    b2t = params["fc2_b"].T                                        # [128, 1]
    w3t = params["fc3_w"].T.astype(jnp.bfloat16)                   # [1, 128]
    b3t = params["fc3_b"].T                                        # [1, 1]

    kernel = _make_fused_kernel(1.0 / float(p_total), float(p_pad - p_total))

    out = pl.pallas_call(
        kernel,
        out_shape=jax.ShapeDtypeStruct((n, 1, 1), jnp.float32),
        grid=(n, n_sp),
        in_specs=[
            pl.BlockSpec((1, PATCH_K, pt), lambda b, s: (b, 0, s)),
            pl.BlockSpec((STEM_COUT, PATCH_K), lambda b, s: (0, 0)),
            pl.BlockSpec((STEM_COUT, 1), lambda b, s: (0, 0)),
            pl.BlockSpec((HID1, STEM_COUT), lambda b, s: (0, 0)),
            pl.BlockSpec((HID1, 1), lambda b, s: (0, 0)),
            pl.BlockSpec((HID2, HID1), lambda b, s: (0, 0)),
            pl.BlockSpec((HID2, 1), lambda b, s: (0, 0)),
            pl.BlockSpec((1, HID2), lambda b, s: (0, 0)),
            pl.BlockSpec((1, 1), lambda b, s: (0, 0)),
        ],
        out_specs=pl.BlockSpec((1, 1, 1), lambda b, s: (b, 0, 0)),
        scratch_shapes=[pltpu.VMEM((STEM_COUT, 1), jnp.float32)],
        compiler_params=pltpu.CompilerParams(
            dimension_semantics=("parallel", "arbitrary")),
    )(pat, wc, bias, w1t, b1t, w2t, b2t, w3t, b3t)

    return out.reshape(n, 1)


# --------------------------- reference & params ----------------------------- #

def _reference_forward(x_nchw, params):
    """Pure-JAX f32 reference (independent conv via lax.conv)."""
    if x_nchw.ndim == 5:
        x_nchw = x_nchw[:, 0]
    y = jax.lax.conv_general_dilated(
        x_nchw, params["stem_w"], window_strides=(STRIDE, STRIDE),
        padding=((1, 1), (1, 1)),
        dimension_numbers=("NCHW", "HWIO", "NCHW"))            # [N,32,OH,OW]
    y = (y * params["stem_scale"].reshape(1, STEM_COUT, 1, 1)
         + params["stem_bias"].reshape(1, STEM_COUT, 1, 1))
    y = y * jax.nn.sigmoid(y)                                  # SiLU
    pooled = y.mean(axis=(2, 3))                               # [N, 32]
    feat = pooled @ params["proj_w"] + params["proj_b"]        # [N, 1280]
    h = jnp.maximum(feat @ params["fc1_w"] + params["fc1_b"], 0.0)
    h = jnp.maximum(h @ params["fc2_w"] + params["fc2_b"], 0.0)
    return h @ params["fc3_w"] + params["fc3_b"]               # [N, 1]


def init_params(key):
    ks = jax.random.split(key, 8)

    def rn(k, shape, s):
        return jax.random.normal(k, shape, jnp.float32) * s

    return {
        # EfficientNet stem conv (3x3, 3->32) with folded BatchNorm
        "stem_w": rn(ks[0], (KSIZE, KSIZE, 3, STEM_COUT), 0.2),
        "stem_scale": 1.0 + rn(ks[5], (1, STEM_COUT), 0.1),
        "stem_bias": rn(ks[6], (1, STEM_COUT), 0.3),
        # projection to feature_dim (stand-in for the MBConv stack + head conv)
        "proj_w": rn(ks[1], (STEM_COUT, FEATURE_DIM), 0.1),
        "proj_b": rn(ks[7], (1, FEATURE_DIM), 0.05),
        # DeepfakeCNN classifier: 1280 -> 512 -> 128 -> 1
        "fc1_w": rn(ks[2], (FEATURE_DIM, HID1), 0.03),
        "fc1_b": jnp.zeros((1, HID1), jnp.float32),
        "fc2_w": rn(ks[3], (HID1, HID2), 0.05),
        "fc2_b": jnp.zeros((1, HID2), jnp.float32),
        "fc3_w": rn(ks[4], (HID2, 1), 0.1),
        "fc3_b": jnp.zeros((1, 1), jnp.float32),
    }


if __name__ == "__main__":
    key = jax.random.PRNGKey(0)
    pkey, xkey = jax.random.split(key)
    params = init_params(pkey)

    # NCHW input, like the PyTorch module: batch=2, 3 channels, 16x16 spatial.
    # OH*OW = 64 -> spatial axis padded to one 128-lane tile, exercising the
    # closed-form padded-column correction.
    x = jax.random.normal(xkey, (2, 3, 16, 16), jnp.float32)

    fwd = jax.jit(deepfake_cnn_forward)
    out = jax.block_until_ready(fwd(x, params))
    assert out.shape == (2, 1), out.shape
    assert bool(jnp.all(jnp.isfinite(out)))

    # Sanity-check against a pure-JAX f32 reference (bf16 weights/activations
    # in the kernel -> loose tolerance).
    ref = _reference_forward(x, params)
    assert bool(jnp.allclose(out, ref, rtol=5e-2, atol=5e-2)), (out, ref)

    print("KERNEL_OK")
</pallas_src>

<mosaic_0001>
module attributes {stable_mosaic.version = 11 : i64} {
  func.func @kernel(%arg0: i32, %arg1: i32, %arg2: memref<1x27x128xbf16, #tpu.memory_space<vmem>>, %arg3: memref<32x27xbf16, #tpu.memory_space<vmem>>, %arg4: memref<32x1xf32, #tpu.memory_space<vmem>>, %arg5: memref<512x32xbf16, #tpu.memory_space<vmem>>, %arg6: memref<512x1xf32, #tpu.memory_space<vmem>>, %arg7: memref<128x512xbf16, #tpu.memory_space<vmem>>, %arg8: memref<128x1xf32, #tpu.memory_space<vmem>>, %arg9: memref<1x128xbf16, #tpu.memory_space<vmem>>, %arg10: memref<1x1xf32, #tpu.memory_space<vmem>>, %arg11: memref<1x1x1xf32, #tpu.memory_space<vmem>>, %arg12: memref<32x1xf32, #tpu.memory_space<vmem>>) attributes {dimension_semantics = [#tpu.dimension_semantics<parallel>, #tpu.dimension_semantics<arbitrary>], iteration_bounds = array<i64: 2, 1>, scalar_prefetch = 0 : i64, scratch_operands = 1 : i64, tpu.core_type = #tpu.core_type<tc>, window_params = [{transform_indices = @transform_0, window_bounds = array<i64: 1, 27, 128>}, {pipeline_mode = #tpu.pipeline_mode<synchronous>, transform_indices = @transform_1, window_bounds = array<i64: 32, 27>}, {pipeline_mode = #tpu.pipeline_mode<synchronous>, transform_indices = @transform_2, window_bounds = array<i64: 32, 1>}, {pipeline_mode = #tpu.pipeline_mode<synchronous>, transform_indices = @transform_3, window_bounds = array<i64: 512, 32>}, {pipeline_mode = #tpu.pipeline_mode<synchronous>, transform_indices = @transform_4, window_bounds = array<i64: 512, 1>}, {pipeline_mode = #tpu.pipeline_mode<synchronous>, transform_indices = @transform_5, window_bounds = array<i64: 128, 512>}, {pipeline_mode = #tpu.pipeline_mode<synchronous>, transform_indices = @transform_6, window_bounds = array<i64: 128, 1>}, {pipeline_mode = #tpu.pipeline_mode<synchronous>, transform_indices = @transform_7, window_bounds = array<i64: 1, 128>}, {pipeline_mode = #tpu.pipeline_mode<synchronous>, transform_indices = @transform_8, window_bounds = array<i64: 1, 1>}, {transform_indices = @transform_9, window_bounds = array<i64: 1, 1, 1>}]} {
    %c0_i32 = arith.constant 0 : i32
    %0 = arith.cmpi eq, %arg1, %c0_i32 : i32
    %1 = arith.extui %0 : i1 to i32
    %c0_i32_0 = arith.constant 0 : i32
    %2 = arith.cmpi ne, %1, %c0_i32_0 : i32
    scf.if %2 {
      %cst_17 = arith.constant 0.000000e+00 : f32
      %26 = vector.broadcast %cst_17 : f32 to vector<32x1xf32>
      %c0_18 = arith.constant 0 : index
      %c0_19 = arith.constant 0 : index
      %27 = vector.load %arg12[%c0_18, %c0_19] : memref<32x1xf32, #tpu.memory_space<vmem>>, vector<32x1xf32>
      tpu.vector_store %arg12[%c0_18, %c0_19], %26 {strides = array<i32>} : memref<32x1xf32, #tpu.memory_space<vmem>>, vector<32x1xf32>,
    } else {
    }
    %c0 = arith.constant 0 : index
    %c0_1 = arith.constant 0 : index
    %3 = vector.load %arg3[%c0, %c0_1] : memref<32x27xbf16, #tpu.memory_space<vmem>>, vector<32x27xbf16>
    %c0_2 = arith.constant 0 : index
    %c0_3 = arith.constant 0 : index
    %c0_4 = arith.constant 0 : index
    %4 = vector.load %arg2[%c0_2, %c0_3, %c0_4] : memref<1x27x128xbf16, #tpu.memory_space<vmem>>, vector<1x27x128xbf16>
    %5 = vector.shape_cast %4 : vector<1x27x128xbf16> to vector<27x128xbf16>
    %cst = arith.constant dense<0.000000e+00> : vector<32x128xf32>
    %6 = tpu.matmul %3, %5, %cst {dimension_numbers = #tpu.dot_dimension_numbers<[1], [0], [0], [1], [0, 0, 1, 1], [], []>} : vector<32x27xbf16>, vector<27x128xbf16>, vector<32x128xf32> -> vector<32x128xf32>
    %c0_5 = arith.constant 0 : index
    %c0_6 = arith.constant 0 : index
    %7 = vector.load %arg4[%c0_5, %c0_6] : memref<32x1xf32, #tpu.memory_space<vmem>>, vector<32x1xf32>
    %8 = vector.broadcast %7 : vector<32x1xf32> to vector<32x128xf32>
    %9 = arith.addf %6, %8 : vector<32x128xf32>
    %cst_7 = arith.constant 5.000000e-01 : f32
    %10 = vector.broadcast %cst_7 : f32 to vector<32x128xf32>
    %11 = arith.mulf %10, %9 : vector<32x128xf32>
    %12 = math.tanh %11 : vector<32x128xf32>
    %cst_8 = arith.constant 1.000000e+00 : f32
    %13 = vector.broadcast %cst_8 : f32 to vector<32x128xf32>
    %14 = arith.addf %12, %13 : vector<32x128xf32>
    %cst_9 = arith.constant 5.000000e-01 : f32
    %15 = vector.broadcast %cst_9 : f32 to vector<32x128xf32>
    %16 = arith.mulf %15, %14 : vector<32x128xf32>
    %17 = arith.mulf %9, %16 : vector<32x128xf32>
    %c0_10 = arith.constant 0 : index
    %c0_11 = arith.constant 0 : index
    %18 = vector.load %arg12[%c0_10, %c0_11] : memref<32x1xf32, #tpu.memory_space<vmem>>, vector<32x1xf32>
    %cst_12 = arith.constant dense<0.000000e+00> : vector<32xf32>
    %19 = vector.multi_reduction <add>, %17, %cst_12 [1] : vector<32x128xf32> to vector<32xf32>
    %20 = vector.shape_cast %19 : vector<32xf32> to vector<32x1xf32>
    %21 = arith.addf %18, %20 : vector<32x1xf32>
    %c0_13 = arith.constant 0 : index
    %c0_14 = arith.constant 0 : index
    %22 = vector.load %arg12[%c0_13, %c0_14] : memref<32x1xf32, #tpu.memory_space<vmem>>, vector<32x1xf32>
    tpu.vector_store %arg12[%c0_13, %c0_14], %21 {strides = array<i32>} : memref<32x1xf32, #tpu.memory_space<vmem>>, vector<32x1xf32>,
    %c0_i32_15 = arith.constant 0 : i32
    %23 = arith.cmpi eq, %arg1, %c0_i32_15 : i32
    %24 = arith.extui %23 : i1 to i32
    %c0_i32_16 = arith.constant 0 : i32
    %25 = arith.cmpi ne, %24, %c0_i32_16 : i32
    scf.if %25 {
      %c0_17 = arith.constant 0 : index
      %c0_18 = arith.constant 0 : index
      %26 = vector.load %arg12[%c0_17, %c0_18] : memref<32x1xf32, #tpu.memory_space<vmem>>, vector<32x1xf32>
      %c0_19 = arith.constant 0 : index
      %c0_20 = arith.constant 0 : index
      %27 = vector.load %arg4[%c0_19, %c0_20] : memref<32x1xf32, #tpu.memory_space<vmem>>, vector<32x1xf32>
      %cst_21 = arith.constant 5.000000e-01 : f32
      %28 = vector.broadcast %cst_21 : f32 to vector<32x1xf32>
      %29 = arith.mulf %28, %27 : vector<32x1xf32>
      %30 = math.tanh %29 : vector<32x1xf32>
      %cst_22 = arith.constant 1.000000e+00 : f32
      %31 = vector.broadcast %cst_22 : f32 to vector<32x1xf32>
      %32 = arith.addf %30, %31 : vector<32x1xf32>
      %cst_23 = arith.constant 5.000000e-01 : f32
      %33 = vector.broadcast %cst_23 : f32 to vector<32x1xf32>
      %34 = arith.mulf %33, %32 : vector<32x1xf32>
      %35 = arith.mulf %27, %34 : vector<32x1xf32>
      %cst_24 = arith.constant 6.400000e+01 : f32
      %36 = vector.broadcast %cst_24 : f32 to vector<32x1xf32>
      %37 = arith.mulf %36, %35 : vector<32x1xf32>
      %38 = arith.subf %26, %37 : vector<32x1xf32>
      %cst_25 = arith.constant 1.562500e-02 : f32
      %39 = vector.broadcast %cst_25 : f32 to vector<32x1xf32>
      %40 = arith.mulf %38, %39 : vector<32x1xf32>
      %41 = arith.truncf %40 : vector<32x1xf32> to vector<32x1xbf16>
      %c0_26 = arith.constant 0 : index
      %c0_27 = arith.constant 0 : index
      %42 = vector.load %arg5[%c0_26, %c0_27] : memref<512x32xbf16, #tpu.memory_space<vmem>>, vector<512x32xbf16>
      %cst_28 = arith.constant dense<0.000000e+00> : vector<512x1xf32>
      %43 = tpu.matmul %42, %41, %cst_28 {dimension_numbers = #tpu.dot_dimension_numbers<[1], [0], [0], [1], [0, 0, 1, 1], [], []>} : vector<512x32xbf16>, vector<32x1xbf16>, vector<512x1xf32> -> vector<512x1xf32>
      %c0_29 = arith.constant 0 : index
      %c0_30 = arith.constant 0 : index
      %44 = vector.load %arg6[%c0_29, %c0_30] : memref<512x1xf32, #tpu.memory_space<vmem>>, vector<512x1xf32>
      %45 = arith.addf %43, %44 : vector<512x1xf32>
      %cst_31 = arith.constant 0.000000e+00 : f32
      %46 = vector.broadcast %cst_31 : f32 to vector<512x1xf32>
      %47 = arith.maximumf %45, %46 : vector<512x1xf32>
      %c0_32 = arith.constant 0 : index
      %c0_33 = arith.constant 0 : index
      %48 = vector.load %arg7[%c0_32, %c0_33] : memref<128x512xbf16, #tpu.memory_space<vmem>>, vector<128x512xbf16>
      %49 = arith.truncf %47 : vector<512x1xf32> to vector<512x1xbf16>
      %cst_34 = arith.constant dense<0.000000e+00> : vector<128x1xf32>
      %50 = tpu.matmul %48, %49, %cst_34 {dimension_numbers = #tpu.dot_dimension_numbers<[1], [0], [0], [1], [0, 0, 1, 1], [], []>} : vector<128x512xbf16>, vector<512x1xbf16>, vector<128x1xf32> -> vector<128x1xf32>
      %c0_35 = arith.constant 0 : index
      %c0_36 = arith.constant 0 : index
      %51 = vector.load %arg8[%c0_35, %c0_36] : memref<128x1xf32, #tpu.memory_space<vmem>>, vector<128x1xf32>
      %52 = arith.addf %50, %51 : vector<128x1xf32>
      %cst_37 = arith.constant 0.000000e+00 : f32
      %53 = vector.broadcast %cst_37 : f32 to vector<128x1xf32>
      %54 = arith.maximumf %52, %53 : vector<128x1xf32>
      %c0_38 = arith.constant 0 : index
      %c0_39 = arith.constant 0 : index
      %55 = vector.load %arg9[%c0_38, %c0_39] : memref<1x128xbf16, #tpu.memory_space<vmem>>, vector<1x128xbf16>
      %56 = arith.truncf %54 : vector<128x1xf32> to vector<128x1xbf16>
      %cst_40 = arith.constant dense<0.000000e+00> : vector<1x1xf32>
      %57 = tpu.matmul %55, %56, %cst_40 {dimension_numbers = #tpu.dot_dimension_numbers<[1], [0], [0], [1], [0, 0, 1, 1], [], []>} : vector<1x128xbf16>, vector<128x1xbf16>, vector<1x1xf32> -> vector<1x1xf32>
      %c0_41 = arith.constant 0 : index
      %c0_42 = arith.constant 0 : index
      %58 = vector.load %arg10[%c0_41, %c0_42] : memref<1x1xf32, #tpu.memory_space<vmem>>, vector<1x1xf32>
      %59 = arith.addf %57, %58 : vector<1x1xf32>
      %60 = vector.shape_cast %59 : vector<1x1xf32> to vector<1x1x1xf32>
      %c0_43 = arith.constant 0 : index
      %c0_44 = arith.constant 0 : index
      %c0_45 = arith.constant 0 : index
      %61 = vector.load %arg11[%c0_43, %c0_44, %c0_45] : memref<1x1x1xf32, #tpu.memory_space<vmem>>, vector<1x1x1xf32>
      tpu.vector_store %arg11[%c0_43, %c0_44, %c0_45], %60 {strides = array<i32>} : memref<1x1x1xf32, #tpu.memory_space<vmem>>, vector<1x1x1xf32>,
    } else {
    }
    return
  }
  func.func @transform_0(%arg0: i32, %arg1: i32) -> (i32, i32, i32) {
    %c0_i32 = arith.constant 0 : i32
    %c0_i32_0 = arith.constant 0 : i32
    return %arg0, %c0_i32, %arg1 : i32, i32, i32
  }
  func.func @transform_1(%arg0: i32, %arg1: i32) -> (i32, i32) {
    %c0_i32 = arith.constant 0 : i32
    %c0_i32_0 = arith.constant 0 : i32
    %c0_i32_1 = arith.constant 0 : i32
    return %c0_i32, %c0_i32_0 : i32, i32
  }
  func.func @transform_2(%arg0: i32, %arg1: i32) -> (i32, i32) {
    %c0_i32 = arith.constant 0 : i32
    %c0_i32_0 = arith.constant 0 : i32
    %c0_i32_1 = arith.constant 0 : i32
    return %c0_i32, %c0_i32_0 : i32, i32
  }
  func.func @transform_3(%arg0: i32, %arg1: i32) -> (i32, i32) {
    %c0_i32 = arith.constant 0 : i32
    %c0_i32_0 = arith.constant 0 : i32
    %c0_i32_1 = arith.constant 0 : i32
    return %c0_i32, %c0_i32_0 : i32, i32
  }
  func.func @transform_4(%arg0: i32, %arg1: i32) -> (i32, i32) {
    %c0_i32 = arith.constant 0 : i32
    %c0_i32_0 = arith.constant 0 : i32
    %c0_i32_1 = arith.constant 0 : i32
    return %c0_i32, %c0_i32_0 : i32, i32
  }
  func.func @transform_5(%arg0: i32, %arg1: i32) -> (i32, i32) {
    %c0_i32 = arith.constant 0 : i32
    %c0_i32_0 = arith.constant 0 : i32
    %c0_i32_1 = arith.constant 0 : i32
    return %c0_i32, %c0_i32_0 : i32, i32
  }
  func.func @transform_6(%arg0: i32, %arg1: i32) -> (i32, i32) {
    %c0_i32 = arith.constant 0 : i32
    %c0_i32_0 = arith.constant 0 : i32
    %c0_i32_1 = arith.constant 0 : i32
    return %c0_i32, %c0_i32_0 : i32, i32
  }
  func.func @transform_7(%arg0: i32, %arg1: i32) -> (i32, i32) {
    %c0_i32 = arith.constant 0 : i32
    %c0_i32_0 = arith.constant 0 : i32
    %c0_i32_1 = arith.constant 0 : i32
    return %c0_i32, %c0_i32_0 : i32, i32
  }
  func.func @transform_8(%arg0: i32, %arg1: i32) -> (i32, i32) {
    %c0_i32 = arith.constant 0 : i32
    %c0_i32_0 = arith.constant 0 : i32
    %c0_i32_1 = arith.constant 0 : i32
    return %c0_i32, %c0_i32_0 : i32, i32
  }
  func.func @transform_9(%arg0: i32, %arg1: i32) -> (i32, i32, i32) {
    %c0_i32 = arith.constant 0 : i32
    %c0_i32_0 = arith.constant 0 : i32
    %c0_i32_1 = arith.constant 0 : i32
    return %arg0, %c0_i32, %c0_i32_0 : i32, i32, i32
  }
}

</mosaic_0001>

<bundles_post_ra>
// kernel: deepfake_cnn_forward.1
= control target key start
LH: loop header
LB: loop body
LE: loop exit
PB: predicated region body
PF: predicated region fallthrough
CT: control target
= control target key end

     0   :  { %s2461_s11 = smov 0   ;;  %s2463_s12 = smov 0   ;;  %s3111_s0 = inlined_call_operand.vmem [shape: bf16[2,27,128], index: 0, kind: input, shape index: {}]   ;;  %s3112_s1 = inlined_call_operand.vmem [shape: bf16[32,27], index: 1, kind: input, shape index: {}]   ;;  %s3113_s2 = inlined_call_operand.vmem [shape: f32[32,1], index: 2, kind: input, shape index: {}]   ;;  %s3114_s3 = inlined_call_operand.vmem [shape: bf16[512,32], index: 3, kind: input, shape index: {}]   ;;  %s3115_s4 = inlined_call_operand.vmem [shape: f32[512,1], index: 4, kind: input, shape index: {}]   ;;  %s3116_s5 = inlined_call_operand.vmem [shape: bf16[128,512], index: 5, kind: input, shape index: {}]   ;;  %s3117_s6 = inlined_call_operand.vmem [shape: f32[128,1], index: 6, kind: input, shape index: {}]   ;;  %s3118_s7 = inlined_call_operand.vmem [shape: bf16[1,128], index: 7, kind: input, shape index: {}]   ;;  %s3119_s8 = inlined_call_operand.<no memory space> [shape: f32[1,1], index: 8, kind: input, shape index: {}]   ;;  %s3120_s9 = inlined_call_operand.vmem [shape: f32[2,1,1], index: 9, kind: output, shape index: {}]  }
   0x1   :  { %v14_v0 = vstv %s3119_s8  ;;  %s2465_s13 = smov 0  }
   0x2   :  { %15 = vst [vmem:[#allocation3] sm:$0x1] %v14_v0 }
   0x3 LB: > { %s33_s8 = sadd.s32 1, %s2398_s12  ;;  %p1871_p0 = scmp.ge.s32.totalorder %s2402_s13, 1  ;;  %s2402_s13 = sphi %s2465_s13, %s21_s13   ;;  %s2398_s12 = sphi %s2463_s12, %s3122_s12   ;;  %s2394_s11 = sphi %s2461_s11, %s3121_s11  }
   0x4   : > { %p35_p1 = scmp.ge.s32.totalorder %s33_s8, 2  ;;  %p306_p2 = scmp.lt.s32.totalorder %s2402_s13, 3 }
   0x6   : > { %s3124_s8 = smov (%p35_p1, %s33_s8), 0  ;;  %p307_p3 = pnand %p1871_p0, %p306_p2 }
   0x7   : > { %p343_p4 = scmp.lt.s32.totalorder (!%p307_p3), %s2394_s11, 1  ;;  %vm424_vm0 = vcmask (!%p307_p3), 1044480   ;;  %v2282_v1 = vld [vmem:[%s3112_s1] sm:$0xff] (!%p307_p3)   ;;  %vm417_vm1 = vcmask (!%p307_p3), 220160   ;;  %vm425_vm2 = vcmask (!%p307_p3), 1045504   ;;  %v2404_v2 = vmov (!%p307_p3), 65535  }
   0x8   : > { %310 = sbr.rel (%p307_p3) target bundleno = 1277 (0x4fd), region = 56  ;;  %v426_v3 = vsel (!%p307_p3), %vm424_vm0, 4294967295, %v2404_v2  ;;  %2158 = vmatprep.mubr.msk.bf16.mxu1 (!%p307_p3), %vm417_vm1, %v2282_v1  ;;  %v2488_v4 = vld [vmem:[%s3113_s2] sm:$0xff] (!%p307_p3)  ;;  %v2493_v5 = vld [vmem:[%s3113_s2 + $0x10] sm:$0xff] (!%p307_p3)  ;;  %v2405_v6 = vmov (!%p307_p3), 0   ;;  %v2499_v7 = vld [vmem:[%s3113_s2 + $0x8] sm:$0xff] (!%p307_p3) }
   0x9   : > { %2278 = vset.pattern.permute.xlu0 (!%p307_p3), %v2405_v6  ;;  %2279 = vset.pattern.permute.xlu1 (!%p307_p3), %v2405_v6  ;;  %v2509_v8 = vld [vmem:[%s3113_s2 + $0x18] sm:$0xff] (!%p307_p3)  ;;  %v427_v10 = vsel (!%p307_p3), %vm425_vm2, %v426_v3, 0  ;;  %v2283_v13 = vld [vmem:[%s3112_s1 + $0x8] sm:$0xff] (!%p307_p3)   ;;  %vm359_vm3 = vcmask (!%p307_p3), 7168   ;;  %v2406_v14 = vmov (!%p307_p3), 0.0   ;;  %v2284_v47 = vld [vmem:[%s3114_s3] sm:$0xff] (!%p307_p3)  }
   0xa   : > { %378 = vperm.xlu0 (!%p307_p3), %2278, %v2488_v4   ;;  %388 = vperm.xlu1 (!%p307_p3), %2279, %v2493_v5   ;;  %360 = vst.msk [vmem:[#allocation2] sm:$0xff] (!%p307_p3), %vm359_vm3, %v2406_v14  ;;  %361 = vst.msk [vmem:[#allocation2 + $0x8] sm:$0xff] (!%p307_p3), %vm359_vm3, %v2406_v14  ;;  %vm854_vm4 = vcmask (!%p307_p3), 261120   ;;  %v532_v48 = vmul.f32 (!%p307_p3), 0.5, %v2488_v4  ;;  %v533_v49 = vmul.f32 (!%p307_p3), 0.5, %v2499_v7  ;;  %v534_v50 = vmul.f32 (!%p307_p3), 0.5, %v2493_v5 }
   0xb   : > { %362 = vst.msk [vmem:[#allocation2 + $0x10] sm:$0xff] (!%p307_p3), %vm359_vm3, %v2406_v14  ;;  %363 = vst.msk [vmem:[#allocation2 + $0x18] sm:$0xff] (!%p307_p3), %vm359_vm3, %v2406_v14  ;;  %v535_v51 = vmul.f32 (!%p307_p3), 0.5, %v2509_v8  ;;  %vm2407_vm5 = vmmov (!%p307_p3), 0   ;;  %vm1804_vm6 = vcmask (!%p307_p3), 0  }
   0xe   : > { %383 = vperm.xlu0 (!%p307_p3), %2278, %v2499_v7   ;;  %393 = vperm.xlu1 (!%p307_p3), %2279, %v2509_v8  }
   0xf   : > { %s3126_s11 = smov (!%p343_p4, %s2394_s11), 1 }
  0x10   : > { %s1978_s20 = sshll.u32 %s3126_s11, 4  ;;  %s353_s16 = scalar_lea.vmem %s3120_s9, %s3126_s11 }
  0x11   : > { %s350_s25 = scalar_lea.vmem %s3111_s0, %s1978_s20  ;;  %v500_v57 = vld [vmem:[#allocation2] sm:$0xff]  ;;  %v501_v61 = vld [vmem:[#allocation2 + $0x8] sm:$0xff] }
  0x12   : > { %v2280_v9 = vld [vmem:[%s350_s25] sm:$0xff]   ;;  %v2281_v11 = vld [vmem:[%s350_s25 + $0x8] sm:$0x3f]   ;;  %v502_v2 = vld [vmem:[#allocation2 + $0x10] sm:$0xff] }
  0x13   : > { %2154 = vmatprep.subr.bf16.mxu1 %v2280_v9  ;;  %v429_v12 = vand.u32 %v2281_v11, %v427_v10 }
  0x14   : > { %2155 = vmatpush3.bf16.msra.mxu1 %v2280_v9 }
  0x15   : > { %2156 = vmatprep.subr.bf16.mxu1 %v429_v12 }
  0x18   : > { %2157 = vmatpush3.bf16.msra.mxu1 %v429_v12 }
  0x1b   : > { %2159 = vmatmul.mubr.msk.bf16.vlgmr.msra.gmra.mrb[0].mxu1 %vm417_vm1, %v2283_v13 }
  0x1c   : > { %2166 = vmatprep.mubr.msk.bf16.mxu1 %vm854_vm4, %v2284_v47  ;;  %v2297_v47 = vld [vmem:[%s3114_s3 + $0x68] sm:$0xff]  }
  0x89   : > { %v389_v15 = vpop.permute.xlu1 %388  ;;  %v379_v16 = vpop.permute.xlu0 %378 }
  0x8d   : > { %v394_v18 = vpop.permute.xlu1 %393  ;;  %v384_v24 = vpop.permute.xlu0 %383 }
  0xee   : > { %v2160_v17 = vpop.f32.mrb[0].mxu1 }
  0xef   : > { %v474_v19 = vadd.f32 %v2160_v17, %v389_v15  ;;  %v465_v20 = vpop.f32.mrb[1].mxu1  ;;  %v503_v15 = vld [vmem:[#allocation2 + $0x18] sm:$0xff] }
  0xf0   : > { %v466_v21 = vadd.f32 %v465_v20, %v379_v16  ;;  %v2161_v22 = vpop.f32.mrb[2].mxu1 }
  0xf1   : > { %v482_v23 = vmul.f32 0.5, %v474_v19  ;;  %v477_v25 = vadd.f32 %v2161_v22, %v394_v18  ;;  %v468_v26 = vpop.f32.mrb[3].mxu1 }
  0xf2   : > { %v480_v27 = vmul.f32 0.5, %v466_v21  ;;  %v469_v28 = vadd.f32 %v468_v26, %v384_v24 }
  0xf3   : > { %2364 = vtanh.f32 %v482_v23  ;;  %v483_v29 = vmul.f32 0.5, %v477_v25 }
  0xf4   : > { %2366 = vtanh.f32 %v480_v27  ;;  %v481_v30 = vmul.f32 0.5, %v469_v28 }
  0xf5   : > { %2368 = vtanh.f32 %v483_v29 }
  0xf6   : > { %2370 = vtanh.f32 %v481_v30 }
  0xf7   : > { %2372 = vtanh.f32 %v532_v48  ;;  %v2298_v48 = vld [vmem:[%s3114_s3 + $0x70] sm:$0xff]  }
  0xf8   : > { %2374 = vtanh.f32 %v533_v49  ;;  %v2299_v49 = vld [vmem:[%s3114_s3 + $0x78] sm:$0xff]  }
  0xf9   : > { %2376 = vtanh.f32 %v534_v50  ;;  %v2300_v50 = vld [vmem:[%s3114_s3 + $0x80] sm:$0xff]  }
  0xfa   : > { %2378 = vtanh.f32 %v535_v51  ;;  %v2301_v51 = vld [vmem:[%s3114_s3 + $0x88] sm:$0xff]  }
  0xfd   : > { %v2365_v31 = vpop.eup %2364 }
  0xfe   : > { %v2367_v32 = vpop.eup %2366  ;;  %v490_v35 = vadd.f32 1.0, %v2365_v31 }
  0xff   : > { %v2369_v33 = vpop.eup %2368  ;;  %v488_v34 = vadd.f32 1.0, %v2367_v32 }
 0x100   : > { %v2371_v36 = vpop.eup %2370  ;;  %v494_v41 = vmul.f32 0.5, %v490_v35  ;;  %v491_v42 = vadd.f32 1.0, %v2369_v33 }
 0x101   : > { %v492_v37 = vmul.f32 0.5, %v488_v34  ;;  %v489_v38 = vadd.f32 1.0, %v2371_v36  ;;  %v2373_v52 = vpop.eup %2372  ;;  %v2286_v36 = vld [vmem:[%s3114_s3 + $0x10] sm:$0xff]  }
 0x102   : > { %v498_v44 = vmul.f32 %v494_v41, %v474_v19  ;;  %v495_v45 = vmul.f32 0.5, %v491_v42  ;;  %v2375_v53 = vpop.eup %2374  ;;  %v540_v54 = vadd.f32 1.0, %v2373_v52  ;;  %v2291_v41 = vld [vmem:[%s3114_s3 + $0x38] sm:$0xff]   ;;  %v2292_v42 = vld [vmem:[%s3114_s3 + $0x40] sm:$0xff]   ;;  %v2302_v52 = vld [vmem:[%s3114_s3 + $0x90] sm:$0xff]  }
 0x103   : > { %v496_v39 = vmul.f32 %v492_v37, %v466_v21  ;;  %v493_v40 = vmul.f32 0.5, %v489_v38  ;;  %v541_v55 = vadd.f32 1.0, %v2375_v53  ;;  %v2377_v56 = vpop.eup %2376  ;;  %v2287_v37 = vld [vmem:[%s3114_s3 + $0x18] sm:$0xff]   ;;  %v2288_v38 = vld [vmem:[%s3114_s3 + $0x20] sm:$0xff]  }
 0x104   : > { %v499_v46 = vmul.f32 %v495_v45, %v477_v25  ;;  %v544_v58 = vmul.f32 0.5, %v540_v54  ;;  %v2379_v59 = vpop.eup %2378  ;;  %v542_v0 = vadd.f32 1.0, %v2377_v56  ;;  %v2295_v45 = vld [vmem:[%s3114_s3 + $0x58] sm:$0xff]   ;;  %v2304_v54 = vld [vmem:[%s3114_s3 + $0xa0] sm:$0xff]   ;;  %v2306_v56 = vld [vmem:[%s3114_s3 + $0xb0] sm:$0xff]  }
 0x105   : > { %504 = vadd.xlane.f32.xlu0 %v496_v39  ;;  %v497_v43 = vmul.f32 %v493_v40, %v469_v28  ;;  %v545_v63 = vmul.f32 0.5, %v541_v55  ;;  %v543_v9 = vadd.f32 1.0, %v2379_v59  ;;  %v2289_v39 = vld [vmem:[%s3114_s3 + $0x28] sm:$0xff]   ;;  %v2290_v40 = vld [vmem:[%s3114_s3 + $0x30] sm:$0xff]   ;;  %v2303_v53 = vld [vmem:[%s3114_s3 + $0x98] sm:$0xff]  }
 0x106   : > { %v548_v6 = vmul.f32 %v544_v58, %v2488_v4  ;;  %v546_v13 = vmul.f32 0.5, %v542_v0  ;;  %v2305_v55 = vld [vmem:[%s3114_s3 + $0xa8] sm:$0xff]   ;;  %v2308_v58 = vld [vmem:[%s3114_s3 + $0xc0] sm:$0xff]   ;;  %v2314_v0 = vld [vmem:[%s3114_s3 + $0xf0] sm:$0xff]  }
 0x107   : > { %506 = vadd.xlane.f32.xlu1 %v497_v43  ;;  %v549_v12 = vmul.f32 %v545_v63, %v2499_v7  ;;  %v547_v17 = vmul.f32 0.5, %v543_v9  ;;  %v2293_v43 = vld [vmem:[%s3114_s3 + $0x48] sm:$0xff]  }
 0x108   : > { %v552_v16 = vmul.f32 64.0, %v548_v6  ;;  %v550_v21 = vmul.f32 %v546_v13, %v2493_v5  ;;  %v2309_v59 = vld [vmem:[%s3114_s3 + $0xc8] sm:$0xff]   ;;  %v630_v6 = vld [vmem:[%s3115_s4] sm:$0xff] }
 0x109   : > { %508 = vadd.xlane.f32.xlu0 %v498_v44  ;;  %v553_v20 = vmul.f32 64.0, %v549_v12  ;;  %v551_v23 = vmul.f32 %v547_v17, %v2509_v8  ;;  %v2285_v8 = vld [vmem:[%s3114_s3 + $0x8] sm:$0xff]   ;;  %v2294_v44 = vld [vmem:[%s3114_s3 + $0x50] sm:$0xff]  }
 0x10a   : > { %v554_v7 = vmul.f32 64.0, %v550_v21  ;;  %v2313_v63 = vld [vmem:[%s3114_s3 + $0xe8] sm:$0xff]  }
 0x10b   : > { %v555_v29 = vmul.f32 64.0, %v551_v23  ;;  %v631_v13 = vld [vmem:[%s3115_s4 + $0x8] sm:$0xff]  ;;  %v636_v23 = vld [vmem:[%s3115_s4 + $0x30] sm:$0xff] }
 0x10d   : > { %510 = vadd.xlane.f32.xlu0 %v499_v46  ;;  %v2296_v46 = vld [vmem:[%s3114_s3 + $0x60] sm:$0xff]  }
 0x192   : > { %v505_v60 = vpop.xlane.xlu0 %504 }
 0x193   : > { %v512_v62 = vadd.f32 %v505_v60, %v500_v57  ;;  %v2307_v57 = vld [vmem:[%s3114_s3 + $0xb8] sm:$0xff]   ;;  %v2310_v60 = vld [vmem:[%s3114_s3 + $0xd0] sm:$0xff]  }
 0x194   : > { %v507_v1 = vpop.xlane.xlu1 %506 }
 0x195   : > { %517 = vst.msk [vmem:[#allocation2] sm:$0xff] %vm359_vm3, %v512_v62  ;;  %v513_v3 = vadd.f32 %v507_v1, %v501_v61  ;;  %v2311_v61 = vld [vmem:[%s3114_s3 + $0xd8] sm:$0xff]   ;;  %v2312_v62 = vld [vmem:[%s3114_s3 + $0xe0] sm:$0xff]  }
 0x196   : > { %v509_v10 = vpop.xlane.xlu0 %508  ;;  %v2315_v1 = vld [vmem:[%s3114_s3 + $0xf8] sm:$0xff]  }
 0x197   : > { %518 = vst.msk [vmem:[#allocation2 + $0x8] sm:$0xff] %vm359_vm3, %v513_v3  ;;  %v514_v11 = vadd.f32 %v509_v10, %v502_v2  ;;  %v2318_v2 = vld [vmem:[%s3116_s5 + $0x4] ss:$16 sps:$4 sm:$0xff]   ;;  %v633_v10 = vld [vmem:[%s3115_s4 + $0x18] sm:$0xff] }
 0x198   : > { %1576 = vmatprep.mubr.bf16.mxu0 %v2318_v2  ;;  %v632_v3 = vld [vmem:[%s3115_s4 + $0x10] sm:$0xff] }
 0x199   : > { %519 = vst.msk [vmem:[#allocation2 + $0x10] sm:$0xff] %vm359_vm3, %v514_v11 }
 0x19a   : > { %v511_v18 = vpop.xlane.xlu0 %510 }
 0x19b   : > { %v515_v19 = vadd.f32 %v511_v18, %v503_v15 }
 0x19c   : > { %v524_v22 = vld [vmem:[#allocation2] sm:$0xff] }
 0x19d   : > { %520 = vst.msk [vmem:[#allocation2 + $0x18] sm:$0xff] %vm359_vm3, %v515_v19  ;;  %v556_v4 = vsub.f32 %v524_v22, %v552_v16 }
 0x19e   : > { %v525_v24 = vld [vmem:[#allocation2 + $0x8] sm:$0xff] }
 0x19f   : > { %v557_v25 = vsub.f32 %v525_v24, %v553_v20  ;;  %v560_v27 = vmul.f32 0.015625, %v556_v4 }
 0x1a0   : > { %v526_v26 = vld [vmem:[#allocation2 + $0x10] sm:$0xff] }
 0x1a1   : > { %v561_v28 = vmul.f32 0.015625, %v557_v25  ;;  %v558_v31 = vsub.f32 %v526_v26, %v554_v7  ;;  %v634_v25 = vld [vmem:[%s3115_s4 + $0x20] sm:$0xff]  ;;  %v637_v26 = vld [vmem:[%s3115_s4 + $0x38] sm:$0xff] }
 0x1a3   : > { %v564_v30 = vpack.c.bf16 %v561_v28, %v560_v27  ;;  %v562_v5 = vmul.f32 0.015625, %v558_v31 }
 0x1a4   : > { %v527_v32 = vld [vmem:[#allocation2 + $0x18] sm:$0xff] }
 0x1a5   : > { %2162 = vmatprep.subr.bf16.mxu1 %v564_v30  ;;  %v559_v33 = vsub.f32 %v527_v32, %v555_v29 }
 0x1a6   : > { %2163 = vmatpush3.bf16.msra.mxu1 %v564_v30  ;;  %v635_v30 = vld [vmem:[%s3115_s4 + $0x28] sm:$0xff] }
 0x1a7   : > { %v563_v34 = vmul.f32 0.015625, %v559_v33 }
 0x1a9   : > { %v565_v35 = vpack.c.bf16 %v563_v34, %v562_v5 }
 0x1ab   : > { %2164 = vmatprep.subr.bf16.mxu1 %v565_v35 }
 0x1ac   : > { %2165 = vmatpush3.bf16.msra.mxu1 %v565_v35 }
 0x1ad   : > { %2230 = vmatprep.subr.bf16.mxu1 %v2406_v14 }
 0x1af   : > { %2167 = vmatmul.mubr.msk.bf16.vlgmr.msra.gmra.mrb[4].mxu1 %vm854_vm4, %v2285_v8 }
 0x1b0   : > { %2170 = vmatprep.mubr.msk.bf16.mxu1 %vm854_vm4, %v2286_v36 }
 0x1b7   : > { %2171 = vmatmul.mubr.msk.bf16.gmra.mrb[8].mxu1 %vm854_vm4, %v2287_v37 }
 0x1b8   : > { %2174 = vmatprep.mubr.msk.bf16.mxu1 %vm854_vm4, %v2288_v38  ;;  %v640_v38 = vld [vmem:[%s3115_s4 + $0x50] sm:$0xff] }
 0x1bf   : > { %2175 = vmatmul.mubr.msk.bf16.gmra.mrb[12].mxu1 %vm854_vm4, %v2289_v39 }
 0x1c0   : > { %2178 = vmatprep.mubr.msk.bf16.mxu1 %vm854_vm4, %v2290_v40  ;;  %v638_v40 = vld [vmem:[%s3115_s4 + $0x40] sm:$0xff] }
 0x1c7   : > { %2179 = vmatmul.mubr.msk.bf16.gmra.mrb[16].mxu1 %vm854_vm4, %v2291_v41 }
 0x1c8   : > { %2182 = vmatprep.mubr.msk.bf16.mxu1 %vm854_vm4, %v2292_v42 }
 0x1cf   : > { %2183 = vmatmul.mubr.msk.bf16.gmra.mrb[20].mxu1 %vm854_vm4, %v2293_v43  ;;  %v641_v43 = vld [vmem:[%s3115_s4 + $0x58] sm:$0xff] }
 0x1d0   : > { %2186 = vmatprep.mubr.msk.bf16.mxu1 %vm854_vm4, %v2294_v44 }
 0x1d7   : > { %2187 = vmatmul.mubr.msk.bf16.gmra.mrb[24].mxu1 %vm854_vm4, %v2295_v45 }
 0x1d8   : > { %2190 = vmatprep.mubr.msk.bf16.mxu1 %vm854_vm4, %v2296_v46  ;;  %v639_v46 = vld [vmem:[%s3115_s4 + $0x48] sm:$0xff] }
 0x1df   : > { %2191 = vmatmul.mubr.msk.bf16.gmra.mrb[28].mxu1 %vm854_vm4, %v2297_v47 }
 0x1e0   : > { %2194 = vmatprep.mubr.msk.bf16.mxu1 %vm854_vm4, %v2298_v48 }
 0x1e7   : > { %2195 = vmatmul.mubr.msk.bf16.gmra.mrb[32].mxu1 %vm854_vm4, %v2299_v49 }
 0x1e8   : > { %2198 = vmatprep.mubr.msk.bf16.mxu1 %vm854_vm4, %v2300_v50 }
 0x1ef   : > { %2199 = vmatmul.mubr.msk.bf16.gmra.mrb[36].mxu1 %vm854_vm4, %v2301_v51 }
 0x1f0   : > { %2202 = vmatprep.mubr.msk.bf16.mxu1 %vm854_vm4, %v2302_v52 }
 0x1f7   : > { %2203 = vmatmul.mubr.msk.bf16.gmra.mrb[40].mxu1 %vm854_vm4, %v2303_v53 }
 0x1f8   : > { %2206 = vmatprep.mubr.msk.bf16.mxu1 %vm854_vm4, %v2304_v54 }
 0x1ff   : > { %2207 = vmatmul.mubr.msk.bf16.gmra.mrb[44].mxu1 %vm854_vm4, %v2305_v55 }
 0x200   : > { %2210 = vmatprep.mubr.msk.bf16.mxu1 %vm854_vm4, %v2306_v56  ;;  %v644_v56 = vld [vmem:[%s3115_s4 + $0x70] sm:$0xff] }
 0x207   : > { %2211 = vmatmul.mubr.msk.bf16.gmra.mrb[48].mxu1 %vm854_vm4, %v2307_v57 }
 0x208   : > { %2214 = vmatprep.mubr.msk.bf16.mxu1 %vm854_vm4, %v2308_v58  ;;  %v642_v58 = vld [vmem:[%s3115_s4 + $0x60] sm:$0xff] }
 0x20f   : > { %2215 = vmatmul.mubr.msk.bf16.gmra.mrb[52].mxu1 %vm854_vm4, %v2309_v59 }
 0x210   : > { %2218 = vmatprep.mubr.msk.bf16.mxu1 %vm854_vm4, %v2310_v60 }
 0x217   : > { %2219 = vmatmul.mubr.msk.bf16.gmra.mrb[56].mxu1 %vm854_vm4, %v2311_v61  ;;  %v645_v61 = vld [vmem:[%s3115_s4 + $0x78] sm:$0xff] }
 0x218   : > { %2222 = vmatprep.mubr.msk.bf16.mxu1 %vm854_vm4, %v2312_v62 }
 0x21f   : > { %2223 = vmatmul.mubr.msk.bf16.gmra.mrb[60].mxu1 %vm854_vm4, %v2313_v63 }
 0x220   : > { %2226 = vmatprep.mubr.msk.bf16.mxu1 %vm854_vm4, %v2314_v0  ;;  %v643_v0 = vld [vmem:[%s3115_s4 + $0x68] sm:$0xff] }
 0x227   : > { %2227 = vmatmul.mubr.msk.bf16.gmra.mrb[64].mxu1 %vm854_vm4, %v2315_v1 }
 0x228   : > { %2246 = vmatprep.mubr.msk.bf16.mxu1 %vm2407_vm5, %v2406_v14 }
 0x282   : > { %v2168_v9 = vpop.f32.mrb[4].mxu1 }
 0x283   : > { %v994_v11 = vadd.f32 %v2168_v9, %v632_v3  ;;  %v985_v12 = vpop.f32.mrb[5].mxu1 }
 0x284   : > { %v986_v15 = vadd.f32 %v985_v12, %v630_v6  ;;  %v2169_v16 = vpop.f32.mrb[6].mxu1 }
 0x285   : > { %v997_v17 = vadd.f32 %v2169_v16, %v633_v10  ;;  %v988_v18 = vpop.f32.mrb[7].mxu1  ;;  %v1242_v20 = vmax.f32 %v994_v11, 0.0 }
 0x286   : > { %v989_v19 = vadd.f32 %v988_v18, %v631_v13  ;;  %v1240_v22 = vmax.f32 %v986_v15, 0.0  ;;  %v648_v15 = vld [vmem:[%s3115_s4 + $0x90] sm:$0xff] }
 0x287   : > { %v1243_v21 = vmax.f32 %v997_v17, 0.0  ;;  %v646_v17 = vld [vmem:[%s3115_s4 + $0x80] sm:$0xff] }
 0x288   : > { %v1241_v4 = vmax.f32 %v989_v19, 0.0 }
 0x289   : > { %v2685_v24 = vpack.c.bf16 %v1243_v21, %v1242_v20  ;;  %v649_v20 = vld [vmem:[%s3115_s4 + $0x98] sm:$0xff] }
 0x28a   : > { %v2172_v7 = vpop.f32.mrb[8].mxu1  ;;  %v2693_v27 = vpack.c.bf16 %v1241_v4, %v1240_v22  ;;  %v647_v4 = vld [vmem:[%s3115_s4 + $0x88] sm:$0xff] }
 0x28b   : > { %v1010_v28 = vadd.f32 %v2172_v7, %v636_v23  ;;  %v1001_v29 = vpop.f32.mrb[9].mxu1 }
 0x28c   : > { %v1002_v31 = vadd.f32 %v1001_v29, %v634_v25  ;;  %v2173_v32 = vpop.f32.mrb[10].mxu1 }
 0x28d   : > { %v1013_v33 = vadd.f32 %v2173_v32, %v637_v26  ;;  %v1004_v5 = vpop.f32.mrb[11].mxu1  ;;  %v1246_v35 = vmax.f32 %v1010_v28, 0.0 }
 0x28e   : > { %v1005_v34 = vadd.f32 %v1004_v5, %v635_v30  ;;  %v1244_v36 = vmax.f32 %v1002_v31, 0.0 }
 0x28f   : > { %v1247_v8 = vmax.f32 %v1013_v33, 0.0  ;;  %v652_v33 = vld [vmem:[%s3115_s4 + $0xb0] sm:$0xff] }
 0x290   : > { %v1245_v37 = vmax.f32 %v1005_v34, 0.0  ;;  %v650_v34 = vld [vmem:[%s3115_s4 + $0xa0] sm:$0xff] }
 0x291   : > { %v2701_v39 = vpack.c.bf16 %v1247_v8, %v1246_v35  ;;  %v653_v8 = vld [vmem:[%s3115_s4 + $0xb8] sm:$0xff] }
 0x292   : > { %v2706_v41 = vpack.c.bf16 %v1245_v37, %v1244_v36  ;;  %v2176_v42 = vpop.f32.mrb[12].mxu1 }
 0x293   : > { %v1026_v44 = vadd.f32 %v2176_v42, %v640_v38  ;;  %v1017_v45 = vpop.f32.mrb[13].mxu1 }
 0x294   : > { %v1018_v47 = vadd.f32 %v1017_v45, %v638_v40  ;;  %v2177_v48 = vpop.f32.mrb[14].mxu1  ;;  %v651_v40 = vld [vmem:[%s3115_s4 + $0xa8] sm:$0xff] }
 0x295   : > { %v1029_v49 = vadd.f32 %v2177_v48, %v641_v43  ;;  %v1020_v50 = vpop.f32.mrb[15].mxu1  ;;  %v1250_v52 = vmax.f32 %v1026_v44, 0.0 }
 0x296   : > { %v1021_v51 = vadd.f32 %v1020_v50, %v639_v46  ;;  %v1248_v54 = vmax.f32 %v1018_v47, 0.0 }
 0x297   : > { %v1251_v53 = vmax.f32 %v1029_v49, 0.0 }
 0x298   : > { %v1249_v55 = vmax.f32 %v1021_v51, 0.0  ;;  %v656_v51 = vld [vmem:[%s3115_s4 + $0xd0] sm:$0xff] }
 0x299   : > { %v2717_v57 = vpack.c.bf16 %v1251_v53, %v1250_v52  ;;  %v654_v53 = vld [vmem:[%s3115_s4 + $0xc0] sm:$0xff] }
 0x29a   : > { %v2722_v59 = vpack.c.bf16 %v1249_v55, %v1248_v54  ;;  %v2180_v60 = vpop.f32.mrb[16].mxu1 }
 0x29b   : > { %v1042_v62 = vadd.f32 %v2180_v60, %v644_v56  ;;  %v1033_v63 = vpop.f32.mrb[17].mxu1  ;;  %v655_v60 = vld [vmem:[%s3115_s4 + $0xc8] sm:$0xff] }
 0x29c   : > { %v1034_v1 = vadd.f32 %v1033_v63, %v642_v58  ;;  %v2181_v2 = vpop.f32.mrb[18].mxu1 }
 0x29d   : > { %v1045_v3 = vadd.f32 %v2181_v2, %v645_v61  ;;  %v1036_v6 = vpop.f32.mrb[19].mxu1  ;;  %v1254_v10 = vmax.f32 %v1042_v62, 0.0 }
 0x29e   : > { %v1037_v9 = vadd.f32 %v1036_v6, %v643_v0  ;;  %v1252_v12 = vmax.f32 %v1034_v1, 0.0 }
 0x29f   : > { %v1255_v11 = vmax.f32 %v1045_v3, 0.0 }
 0x2a0   : > { %v1253_v13 = vmax.f32 %v1037_v9, 0.0  ;;  %v660_v9 = vld [vmem:[%s3115_s4 + $0xf0] sm:$0xff] }
 0x2a1   : > { %v2733_v16 = vpack.c.bf16 %v1255_v11, %v1254_v10  ;;  %v658_v11 = vld [vmem:[%s3115_s4 + $0xe0] sm:$0xff] }
 0x2a2   : > { %v2738_v18 = vpack.c.bf16 %v1253_v13, %v1252_v12  ;;  %v2184_v19 = vpop.f32.mrb[20].mxu1 }
 0x2a3   : > { %v1058_v21 = vadd.f32 %v2184_v19, %v648_v15  ;;  %v1049_v22 = vpop.f32.mrb[21].mxu1  ;;  %v659_v19 = vld [vmem:[%s3115_s4 + $0xe8] sm:$0xff] }
 0x2a4   : > { %v1050_v23 = vadd.f32 %v1049_v22, %v646_v17  ;;  %v2185_v25 = vpop.f32.mrb[22].mxu1 }
 0x2a5   : > { %v1061_v7 = vadd.f32 %v2185_v25, %v649_v20  ;;  %v1052_v26 = vpop.f32.mrb[23].mxu1  ;;  %v1258_v29 = vmax.f32 %v1058_v21, 0.0 }
 0x2a6   : > { %v1053_v28 = vadd.f32 %v1052_v26, %v647_v4  ;;  %v1256_v31 = vmax.f32 %v1050_v23, 0.0 }
 0x2a7   : > { %v1259_v30 = vmax.f32 %v1061_v7, 0.0 }
 0x2a8   : > { %v1257_v32 = vmax.f32 %v1053_v28, 0.0  ;;  %v664_v28 = vld [vmem:[%s3115_s4 + $0x110] sm:$0xff] }
 0x2a9   : > { %v1345_v5 = vpack.c.bf16 %v1259_v30, %v1258_v29  ;;  %v662_v30 = vld [vmem:[%s3115_s4 + $0x100] sm:$0xff] }
 0x2aa   : > { %v2188_v35 = vpop.f32.mrb[24].mxu1  ;;  %v1344_v36 = vpack.c.bf16 %v1257_v32, %v1256_v31 }
 0x2ab   : > { %v1074_v37 = vadd.f32 %v2188_v35, %v652_v33  ;;  %v1065_v38 = vpop.f32.mrb[25].mxu1 }
 0x2ac   : > { %v1066_v42 = vadd.f32 %v1065_v38, %v650_v34  ;;  %v2189_v43 = vpop.f32.mrb[26].mxu1  ;;  %2017 = vmatprep.subr.bf16.mxu0 %v1344_v36  ;;  %v663_v34 = vld [vmem:[%s3115_s4 + $0x108] sm:$0xff] }
 0x2ad   : > { %v1077_v44 = vadd.f32 %v2189_v43, %v653_v8  ;;  %v1068_v45 = vpop.f32.mrb[27].mxu1  ;;  %2018 = vmatpush3.bf16.msra.mxu0 %v2693_v27  ;;  %v1262_v47 = vmax.f32 %v1074_v37, 0.0  ;;  %v657_v27 = vld [vmem:[%s3115_s4 + $0xd8] sm:$0xff] }
 0x2ae   : > { %v1069_v46 = vadd.f32 %v1068_v45, %v651_v40  ;;  %2019 = vmatprep.subr.bf16.mxu0 %v1345_v5  ;;  %v1260_v49 = vmax.f32 %v1066_v42, 0.0  ;;  %v2316_v45 = vld [vmem:[%s3116_s5] ss:$16 sps:$4 sm:$0xff]  }
 0x2af   : > { %v1263_v48 = vmax.f32 %v1077_v44, 0.0  ;;  %v668_v44 = vld [vmem:[%s3115_s4 + $0x130] sm:$0xff] }
 0x2b0   : > { %v1261_v50 = vmax.f32 %v1069_v46, 0.0 }
 0x2b1   : > { %v1347_v52 = vpack.c.bf16 %v1263_v48, %v1262_v47  ;;  %2020 = vmatpush3.bf16.msra.mxu0 %v2685_v24  ;;  %v2319_v47 = vld [vmem:[%s3116_s5 + $0x24] ss:$16 sps:$4 sm:$0xff]  }
 0x2b2   : > { %v1346_v54 = vpack.c.bf16 %v1261_v50, %v1260_v49  ;;  %v2192_v55 = vpop.f32.mrb[28].mxu1  ;;  %v669_v50 = vld [vmem:[%s3115_s4 + $0x138] sm:$0xff] }
 0x2b3   : > { %v1090_v56 = vadd.f32 %v2192_v55, %v656_v51  ;;  %v1081_v58 = vpop.f32.mrb[29].mxu1 }
 0x2b4   : > { %v1082_v61 = vadd.f32 %v1081_v58, %v654_v53  ;;  %v2193_v62 = vpop.f32.mrb[30].mxu1  ;;  %2021 = vmatprep.subr.bf16.mxu0 %v1346_v54 }
 0x2b5   : > { %v1093_v24 = vadd.f32 %v2193_v62, %v657_v27  ;;  %v1084_v63 = vpop.f32.mrb[31].mxu1  ;;  %2022 = vmatpush3.bf16.msra.mxu0 %v2706_v41  ;;  %v1266_v1 = vmax.f32 %v1090_v56, 0.0  ;;  %v661_v41 = vld [vmem:[%s3115_s4 + $0xf8] sm:$0xff] }
 0x2b6   : > { %v1085_v0 = vadd.f32 %v1084_v63, %v655_v60  ;;  %2023 = vmatprep.subr.bf16.mxu0 %v1347_v52  ;;  %v1264_v3 = vmax.f32 %v1082_v61, 0.0  ;;  %v2321_v63 = vld [vmem:[%s3116_s5 + $0x20] ss:$16 sps:$4 sm:$0xff]  }
 0x2b7   : > { %v1267_v2 = vmax.f32 %v1093_v24, 0.0  ;;  %v672_v24 = vld [vmem:[%s3115_s4 + $0x150] sm:$0xff] }
 0x2b8   : > { %v1265_v6 = vmax.f32 %v1085_v0, 0.0 }
 0x2b9   : > { %v1349_v10 = vpack.c.bf16 %v1267_v2, %v1266_v1  ;;  %2024 = vmatpush3.bf16.msra.mxu0 %v2701_v39  ;;  %v670_v1 = vld [vmem:[%s3115_s4 + $0x140] sm:$0xff] }
 0x2ba   : > { %v1348_v12 = vpack.c.bf16 %v1265_v6, %v1264_v3  ;;  %v2196_v13 = vpop.f32.mrb[32].mxu1  ;;  %v2322_v2 = vld [vmem:[%s3116_s5 + $0x44] ss:$16 sps:$4 sm:$0xff]  }
 0x2bb   : > { %v1106_v15 = vadd.f32 %v2196_v13, %v660_v9  ;;  %v1097_v17 = vpop.f32.mrb[33].mxu1  ;;  %v673_v9 = vld [vmem:[%s3115_s4 + $0x158] sm:$0xff] }
 0x2bc   : > { %v1098_v20 = vadd.f32 %v1097_v17, %v658_v11  ;;  %v2197_v21 = vpop.f32.mrb[34].mxu1  ;;  %2025 = vmatprep.subr.bf16.mxu0 %v1348_v12  ;;  %v671_v12 = vld [vmem:[%s3115_s4 + $0x148] sm:$0xff] }
 0x2bd   : > { %v1109_v39 = vadd.f32 %v2197_v21, %v661_v41  ;;  %v1100_v22 = vpop.f32.mrb[35].mxu1  ;;  %2026 = vmatpush3.bf16.msra.mxu0 %v2722_v59  ;;  %v1270_v23 = vmax.f32 %v1106_v15, 0.0  ;;  %v665_v59 = vld [vmem:[%s3115_s4 + $0x118] sm:$0xff] }
 0x2be   : > { %v1101_v4 = vadd.f32 %v1100_v22, %v659_v19  ;;  %2027 = vmatprep.subr.bf16.mxu0 %v1349_v10  ;;  %v1268_v7 = vmax.f32 %v1098_v20, 0.0 }
 0x2bf   : > { %v1271_v25 = vmax.f32 %v1109_v39, 0.0 }
 0x2c0   : > { %v1269_v26 = vmax.f32 %v1101_v4, 0.0  ;;  %v676_v4 = vld [vmem:[%s3115_s4 + $0x170] sm:$0xff] }
 0x2c1   : > { %v1351_v29 = vpack.c.bf16 %v1271_v25, %v1270_v23  ;;  %2028 = vmatpush3.bf16.msra.mxu0 %v2717_v57  ;;  %v2324_v23 = vld [vmem:[%s3116_s5 + $0x40] ss:$16 sps:$4 sm:$0xff]  }
 0x2c2   : > { %v1350_v31 = vpack.c.bf16 %v1269_v26, %v1268_v7  ;;  %v2200_v32 = vpop.f32.mrb[36].mxu1  ;;  %v674_v7 = vld [vmem:[%s3115_s4 + $0x160] sm:$0xff] }
 0x2c3   : > { %v1122_v33 = vadd.f32 %v2200_v32, %v664_v28  ;;  %v1113_v5 = vpop.f32.mrb[37].mxu1  ;;  %v2325_v26 = vld [vmem:[%s3116_s5 + $0x64] ss:$16 sps:$4 sm:$0xff]  }
 0x2c4   : > { %v1114_v35 = vadd.f32 %v1113_v5, %v662_v30  ;;  %v2201_v8 = vpop.f32.mrb[38].mxu1  ;;  %2029 = vmatprep.subr.bf16.mxu0 %v1350_v31  ;;  %v677_v30 = vld [vmem:[%s3115_s4 + $0x178] sm:$0xff] }
 0x2c5   : > { %v1125_v57 = vadd.f32 %v2201_v8, %v665_v59  ;;  %v1116_v36 = vpop.f32.mrb[39].mxu1  ;;  %2030 = vmatpush3.bf16.msra.mxu0 %v2738_v18  ;;  %v1274_v38 = vmax.f32 %v1122_v33, 0.0  ;;  %v666_v18 = vld [vmem:[%s3115_s4 + $0x120] sm:$0xff]  ;;  %v675_v59 = vld [vmem:[%s3115_s4 + $0x168] sm:$0xff] }
 0x2c6   : > { %v1117_v37 = vadd.f32 %v1116_v36, %v663_v34  ;;  %2031 = vmatprep.subr.bf16.mxu0 %v1351_v29  ;;  %v1272_v42 = vmax.f32 %v1114_v35, 0.0 }
 0x2c7   : > { %v1275_v40 = vmax.f32 %v1125_v57, 0.0 }
 0x2c8   : > { %v1273_v43 = vmax.f32 %v1117_v37, 0.0 }
 0x2c9   : > { %v2807_v46 = vpack.c.bf16 %v1275_v40, %v1274_v38  ;;  %2032 = vmatpush3.bf16.msra.mxu0 %v2733_v16  ;;  %v667_v16 = vld [vmem:[%s3115_s4 + $0x128] sm:$0xff]  ;;  %v680_v40 = vld [vmem:[%s3115_s4 + $0x190] sm:$0xff] }
 0x2ca   : > { %v2816_v48 = vpack.c.bf16 %v1273_v43, %v1272_v42  ;;  %v2204_v49 = vpop.f32.mrb[40].mxu1  ;;  %v2327_v42 = vld [vmem:[%s3116_s5 + $0x60] ss:$16 sps:$4 sm:$0xff]  }
 0x2cb   : > { %v1138_v51 = vadd.f32 %v2204_v49, %v668_v44  ;;  %v1129_v52 = vpop.f32.mrb[41].mxu1  ;;  %v678_v44 = vld [vmem:[%s3115_s4 + $0x180] sm:$0xff]  ;;  %v681_v49 = vld [vmem:[%s3115_s4 + $0x198] sm:$0xff] }
 0x2cc   : > { %v1130_v53 = vadd.f32 %v1129_v52, %v666_v18  ;;  %v2205_v54 = vpop.f32.mrb[42].mxu1  ;;  %1577 = vmatmul.mubr.bf16.vlgmr.msra.gmra.mrb[0].mxu0 %v2316_v45  ;;  %v2328_v45 = vld [vmem:[%s3116_s5 + $0x84] ss:$16 sps:$4 sm:$0xff]   ;;  %v679_v52 = vld [vmem:[%s3115_s4 + $0x188] sm:$0xff] }
 0x2cd   : > { %v1141_v55 = vadd.f32 %v2205_v54, %v669_v50  ;;  %v1132_v27 = vpop.f32.mrb[43].mxu1  ;;  %1584 = vmatprep.mubr.bf16.mxu0 %v2319_v47  ;;  %v1278_v58 = vmax.f32 %v1138_v51, 0.0 }
 0x2ce   : > { %v1133_v56 = vadd.f32 %v1132_v27, %v667_v16  ;;  %v1276_v61 = vmax.f32 %v1130_v53, 0.0 }
 0x2cf   : > { %v1279_v60 = vmax.f32 %v1141_v55, 0.0 }
 0x2d0   : > { %v1277_v62 = vmax.f32 %v1133_v56, 0.0 }
 0x2d1   : > { %v2830_v0 = vpack.c.bf16 %v1279_v60, %v1278_v58 }
 0x2d2   : > { %v2838_v3 = vpack.c.bf16 %v1277_v62, %v1276_v61  ;;  %v2208_v6 = vpop.f32.mrb[44].mxu1  ;;  %v684_v62 = vld [vmem:[%s3115_s4 + $0x1b0] sm:$0xff] }
 0x2d3   : > { %v1154_v10 = vadd.f32 %v2208_v6, %v672_v24  ;;  %v1145_v11 = vpop.f32.mrb[45].mxu1  ;;  %v2330_v24 = vld [vmem:[%s3116_s5 + $0x80] ss:$16 sps:$4 sm:$0xff]  }
 0x2d4   : > { %v1146_v13 = vadd.f32 %v1145_v11, %v670_v1  ;;  %v2209_v41 = vpop.f32.mrb[46].mxu1  ;;  %1585 = vmatmul.mubr.bf16.gmra.mrb[4].mxu0 %v2321_v63  ;;  %v682_v1 = vld [vmem:[%s3115_s4 + $0x1a0] sm:$0xff] }
 0x2d5   : > { %v1157_v15 = vadd.f32 %v2209_v41, %v673_v9  ;;  %v1148_v17 = vpop.f32.mrb[47].mxu1  ;;  %1592 = vmatprep.mubr.bf16.mxu0 %v2322_v2  ;;  %v1282_v20 = vmax.f32 %v1154_v10, 0.0  ;;  %v2331_v2 = vld [vmem:[%s3116_s5 + $0xa4] ss:$16 sps:$4 sm:$0xff]   ;;  %v685_v10 = vld [vmem:[%s3115_s4 + $0x1b8] sm:$0xff] }
 0x2d6   : > { %v1149_v19 = vadd.f32 %v1148_v17, %v671_v12  ;;  %v1280_v39 = vmax.f32 %v1146_v13, 0.0  ;;  %v683_v13 = vld [vmem:[%s3115_s4 + $0x1a8] sm:$0xff] }
 0x2d7   : > { %v1283_v21 = vmax.f32 %v1157_v15, 0.0 }
 0x2d8   : > { %v1281_v22 = vmax.f32 %v1149_v19, 0.0 }
 0x2d9   : > { %v2852_v25 = vpack.c.bf16 %v1283_v21, %v1282_v20 }
 0x2da   : > { %v2860_v28 = vpack.c.bf16 %v1281_v22, %v1280_v39  ;;  %v2212_v29 = vpop.f32.mrb[48].mxu1 }
 0x2db   : > { %v1170_v31 = vadd.f32 %v2212_v29, %v676_v4  ;;  %v1161_v32 = vpop.f32.mrb[49].mxu1  ;;  %v2334_v29 = vld [vmem:[%s3116_s5 + $0xc4] ss:$16 sps:$4 sm:$0xff]  }
 0x2dc   : > { %v1162_v33 = vadd.f32 %v1161_v32, %v674_v7  ;;  %v2213_v5 = vpop.f32.mrb[50].mxu1  ;;  %1593 = vmatmul.mubr.bf16.gmra.mrb[8].mxu0 %v2324_v23  ;;  %v688_v23 = vld [vmem:[%s3115_s4 + $0x1d0] sm:$0xff]  ;;  %v689_v32 = vld [vmem:[%s3115_s4 + $0x1d8] sm:$0xff] }
 0x2dd   : > { %v1173_v34 = vadd.f32 %v2213_v5, %v677_v30  ;;  %v1164_v35 = vpop.f32.mrb[51].mxu1  ;;  %1600 = vmatprep.mubr.bf16.mxu0 %v2325_v26  ;;  %v1286_v57 = vmax.f32 %v1170_v31, 0.0  ;;  %v2333_v7 = vld [vmem:[%s3116_s5 + $0xa0] ss:$16 sps:$4 sm:$0xff]  }
 0x2de   : > { %v1165_v8 = vadd.f32 %v1164_v35, %v675_v59  ;;  %v1284_v37 = vmax.f32 %v1162_v33, 0.0 }
 0x2df   : > { %v1287_v36 = vmax.f32 %v1173_v34, 0.0 }
 0x2e0   : > { %v1285_v38 = vmax.f32 %v1165_v8, 0.0 }
 0x2e1   : > { %v2874_v43 = vpack.c.bf16 %v1287_v36, %v1286_v57 }
 0x2e2   : > { %v2882_v18 = vpack.c.bf16 %v1285_v38, %v1284_v37  ;;  %v2216_v47 = vpop.f32.mrb[52].mxu1 }
 0x2e3   : > { %v1186_v50 = vadd.f32 %v2216_v47, %v680_v40  ;;  %v1177_v51 = vpop.f32.mrb[53].mxu1  ;;  %v2337_v47 = vld [vmem:[%s3116_s5 + $0xe4] ss:$16 sps:$4 sm:$0xff]  }
 0x2e4   : > { %v1178_v16 = vadd.f32 %v1177_v51, %v678_v44  ;;  %v2217_v53 = vpop.f32.mrb[54].mxu1  ;;  %1601 = vmatmul.mubr.bf16.gmra.mrb[12].mxu0 %v2327_v42  ;;  %v692_v42 = vld [vmem:[%s3115_s4 + $0x1f0] sm:$0xff]  ;;  %v693_v51 = vld [vmem:[%s3115_s4 + $0x1f8] sm:$0xff] }
 0x2e5   : > { %v1189_v54 = vadd.f32 %v2217_v53, %v681_v49  ;;  %v1180_v55 = vpop.f32.mrb[55].mxu1  ;;  %1608 = vmatprep.mubr.bf16.mxu0 %v2328_v45  ;;  %v1290_v56 = vmax.f32 %v1186_v50, 0.0  ;;  %v2336_v44 = vld [vmem:[%s3116_s5 + $0xc0] ss:$16 sps:$4 sm:$0xff]  }
 0x2e6   : > { %v1181_v27 = vadd.f32 %v1180_v55, %v679_v52  ;;  %v1288_v60 = vmax.f32 %v1178_v16, 0.0 }
 0x2e7   : > { %v1291_v58 = vmax.f32 %v1189_v54, 0.0 }
 0x2e8   : > { %v1289_v61 = vmax.f32 %v1181_v27, 0.0 }
 0x2e9   : > { %v1361_v63 = vpack.c.bf16 %v1291_v58, %v1290_v56 }
 0x2ea   : > { %v1360_v6 = vpack.c.bf16 %v1289_v61, %v1288_v60  ;;  %v2220_v9 = vpop.f32.mrb[56].mxu1 }
 0x2eb   : > { %v1202_v11 = vadd.f32 %v2220_v9, %v684_v62  ;;  %v1193_v12 = vpop.f32.mrb[57].mxu1  ;;  %v2349_v9 = vld [vmem:[%s3116_s5 + $0x6c] ss:$16 sps:$4 sm:$0xff]  }
 0x2ec   : > { %v1194_v41 = vadd.f32 %v1193_v12, %v682_v1  ;;  %v2221_v15 = vpop.f32.mrb[58].mxu1  ;;  %1609 = vmatmul.mubr.bf16.gmra.mrb[16].mxu0 %v2330_v24  ;;  %2081 = vmatprep.subr.bf16.mxu0 %v1360_v6  ;;  %v2339_v24 = vld [vmem:[%s3116_s5 + $0xe0] ss:$16 sps:$4 sm:$0xff]   ;;  %v2342_v1 = vld [vmem:[%s3116_s5 + $0xc] ss:$16 sps:$4 sm:$0xff]  }
 0x2ed   : > { %v1205_v17 = vadd.f32 %v2221_v15, %v685_v10  ;;  %v1196_v19 = vpop.f32.mrb[59].mxu1  ;;  %2082 = vmatpush3.bf16.msra.mxu0 %v2816_v48  ;;  %1616 = vmatprep.mubr.bf16.mxu0 %v2331_v2  ;;  %v1294_v21 = vmax.f32 %v1202_v11, 0.0  ;;  %v686_v48 = vld [vmem:[%s3115_s4 + $0x1c0] sm:$0xff]  ;;  %v2345_v6 = vld [vmem:[%s3116_s5 + $0x28] ss:$16 sps:$4 sm:$0xff]  }
 0x2ee   : > { %v1197_v20 = vadd.f32 %v1196_v19, %v683_v13  ;;  %2083 = vmatprep.subr.bf16.mxu0 %v1361_v63  ;;  %v1292_v22 = vmax.f32 %v1194_v41, 0.0  ;;  %v2351_v10 = vld [vmem:[%s3116_s5 + $0x68] ss:$16 sps:$4 sm:$0xff]   ;;  %v2352_v11 = vld [vmem:[%s3116_s5 + $0x8c] ss:$16 sps:$4 sm:$0xff]  }
 0x2ef   : > { %v1295_v39 = vmax.f32 %v1205_v17, 0.0  ;;  %v2354_v12 = vld [vmem:[%s3116_s5 + $0x88] ss:$16 sps:$4 sm:$0xff]   ;;  %v2355_v13 = vld [vmem:[%s3116_s5 + $0xac] ss:$16 sps:$4 sm:$0xff]  }
 0x2f0   : > { %v1293_v4 = vmax.f32 %v1197_v20, 0.0  ;;  %v2357_v41 = vld [vmem:[%s3116_s5 + $0xa8] ss:$16 sps:$4 sm:$0xff]   ;;  %v2358_v15 = vld [vmem:[%s3116_s5 + $0xcc] ss:$16 sps:$4 sm:$0xff]  }
 0x2f1   : > { %v1363_v26 = vpack.c.bf16 %v1295_v39, %v1294_v21  ;;  %2084 = vmatpush3.bf16.msra.mxu0 %v2807_v46  ;;  %v687_v46 = vld [vmem:[%s3115_s4 + $0x1c8] sm:$0xff] }
 0x2f2   : > { %v1362_v30 = vpack.c.bf16 %v1293_v4, %v1292_v22  ;;  %v2224_v31 = vpop.f32.mrb[60].mxu1  ;;  %v2360_v17 = vld [vmem:[%s3116_s5 + $0xc8] ss:$16 sps:$4 sm:$0xff]   ;;  %v2361_v19 = vld [vmem:[%s3116_s5 + $0xec] ss:$16 sps:$4 sm:$0xff]  }
 0x2f3   : > { %v1218_v59 = vadd.f32 %v2224_v31, %v688_v23  ;;  %v1209_v33 = vpop.f32.mrb[61].mxu1  ;;  %v2363_v20 = vld [vmem:[%s3116_s5 + $0xe8] ss:$16 sps:$4 sm:$0xff]  }
 0x2f4   : > { %v1210_v5 = vadd.f32 %v1209_v33, %v686_v48  ;;  %v2225_v34 = vpop.f32.mrb[62].mxu1  ;;  %1617 = vmatmul.mubr.bf16.gmra.mrb[20].mxu0 %v2333_v7  ;;  %2085 = vmatprep.subr.bf16.mxu0 %v1362_v30 }
 0x2f5   : > { %v1221_v35 = vadd.f32 %v2225_v34, %v689_v32  ;;  %v1212_v8 = vpop.f32.mrb[63].mxu1  ;;  %2086 = vmatpush3.bf16.msra.mxu0 %v2838_v3  ;;  %1624 = vmatprep.mubr.bf16.mxu0 %v2334_v29  ;;  %v1298_v36 = vmax.f32 %v1218_v59, 0.0  ;;  %v690_v3 = vld [vmem:[%s3115_s4 + $0x1e0] sm:$0xff] }
 0x2f6   : > { %v1213_v57 = vadd.f32 %v1212_v8, %v687_v46  ;;  %2087 = vmatprep.subr.bf16.mxu0 %v1363_v26  ;;  %v1296_v38 = vmax.f32 %v1210_v5, 0.0 }
 0x2f7   : > { %v1299_v37 = vmax.f32 %v1221_v35, 0.0 }
 0x2f8   : > { %v1297_v40 = vmax.f32 %v1213_v57, 0.0 }
 0x2f9   : > { %v1365_v45 = vpack.c.bf16 %v1299_v37, %v1298_v36  ;;  %2088 = vmatpush3.bf16.msra.mxu0 %v2830_v0  ;;  %v691_v0 = vld [vmem:[%s3115_s4 + $0x1e8] sm:$0xff] }
 0x2fa   : > { %v1364_v49 = vpack.c.bf16 %v1297_v40, %v1296_v38  ;;  %v2228_v50 = vpop.f32.mrb[64].mxu1 }
 0x2fb   : > { %v1234_v52 = vadd.f32 %v2228_v50, %v692_v42  ;;  %v1225_v16 = vpop.f32.mrb[65].mxu1 }
 0x2fc   : > { %v1226_v53 = vadd.f32 %v1225_v16, %v690_v3  ;;  %v2229_v54 = vpop.f32.mrb[66].mxu1  ;;  %1625 = vmatmul.mubr.bf16.gmra.mrb[24].mxu0 %v2336_v44  ;;  %2089 = vmatprep.subr.bf16.mxu0 %v1364_v49 }
 0x2fd   : > { %v1237_v55 = vadd.f32 %v2229_v54, %v693_v51  ;;  %v1228_v27 = vpop.f32.mrb[67].mxu1  ;;  %2090 = vmatpush3.bf16.msra.mxu0 %v2860_v28  ;;  %1632 = vmatprep.mubr.bf16.mxu0 %v2337_v47  ;;  %v1302_v58 = vmax.f32 %v1234_v52, 0.0  ;;  %v2340_v28 = vld [vmem:[%s3116_s5 + $0x8] ss:$16 sps:$4 sm:$0xff]  }
 0x2fe   : > { %v1229_v56 = vadd.f32 %v1228_v27, %v691_v0  ;;  %2091 = vmatprep.subr.bf16.mxu0 %v1365_v45  ;;  %v1300_v61 = vmax.f32 %v1226_v53, 0.0 }
 0x2ff   : > { %v1303_v60 = vmax.f32 %v1237_v55, 0.0 }
 0x300   : > { %v1301_v62 = vmax.f32 %v1229_v56, 0.0 }
 0x301   : > { %v1367_v63 = vpack.c.bf16 %v1303_v60, %v1302_v58  ;;  %2092 = vmatpush3.bf16.msra.mxu0 %v2852_v25  ;;  %v2343_v25 = vld [vmem:[%s3116_s5 + $0x2c] ss:$16 sps:$4 sm:$0xff]  }
 0x302   : > { %v1366_v2 = vpack.c.bf16 %v1301_v62, %v1300_v61 }
 0x304   : > { %1633 = vmatmul.mubr.bf16.gmra.mrb[28].mxu0 %v2339_v24  ;;  %2093 = vmatprep.subr.bf16.mxu0 %v1366_v2 }
 0x305   : > { %2094 = vmatpush3.bf16.msra.mxu0 %v2882_v18  ;;  %1673 = vmatprep.mubr.bf16.mxu0 %v2342_v1  ;;  %v2346_v18 = vld [vmem:[%s3116_s5 + $0x4c] ss:$16 sps:$4 sm:$0xff]  }
 0x306   : > { %2095 = vmatprep.subr.bf16.mxu0 %v1367_v63 }
 0x309   : > { %2096 = vmatpush3.bf16.msra.mxu0 %v2874_v43  ;;  %v2348_v43 = vld [vmem:[%s3116_s5 + $0x48] ss:$16 sps:$4 sm:$0xff]  }
 0x30c   : > { %1674 = vmatmul.mubr.bf16.vlgmr.msra.gmra.mrb[32].mxu0 %v2340_v28  ;;  %v1368_v28 = vld [vmem:[%s3117_s6] sm:$0xff] }
 0x30d   : > { %1681 = vmatprep.mubr.bf16.mxu0 %v2343_v25 }
 0x314   : > { %1682 = vmatmul.mubr.bf16.gmra.mrb[36].mxu0 %v2345_v6  ;;  %v1369_v6 = vld [vmem:[%s3117_s6 + $0x8] sm:$0xff] }
 0x315   : > { %1689 = vmatprep.mubr.bf16.mxu0 %v2346_v18 }
 0x31c   : > { %1690 = vmatmul.mubr.bf16.gmra.mrb[40].mxu0 %v2348_v43 }
 0x31d   : > { %1697 = vmatprep.mubr.bf16.mxu0 %v2349_v9 }
 0x324   : > { %1698 = vmatmul.mubr.bf16.gmra.mrb[44].mxu0 %v2351_v10 }
 0x325   : > { %1705 = vmatprep.mubr.bf16.mxu0 %v2352_v11 }
 0x32c   : > { %1706 = vmatmul.mubr.bf16.gmra.mrb[48].mxu0 %v2354_v12 }
 0x32d   : > { %1713 = vmatprep.mubr.bf16.mxu0 %v2355_v13 }
 0x334   : > { %1714 = vmatmul.mubr.bf16.gmra.mrb[52].mxu0 %v2357_v41 }
 0x335   : > { %1721 = vmatprep.mubr.bf16.mxu0 %v2358_v15 }
 0x33c   : > { %1722 = vmatmul.mubr.bf16.gmra.mrb[56].mxu0 %v2360_v17  ;;  %v1370_v17 = vld [vmem:[%s3117_s6 + $0x10] sm:$0xff] }
 0x33d   : > { %1729 = vmatprep.mubr.bf16.mxu0 %v2361_v19 }
 0x344   : > { %1730 = vmatmul.mubr.bf16.gmra.mrb[60].mxu0 %v2363_v20 }
 0x39f   : > { %v2033_v21 = vpop.f32.mrb[0].mxu0 }
 0x3a0   : > { %v2034_v39 = vpop.f32.mrb[1].mxu0 }
 0x3a1   : > { %v2035_v22 = vadd.f32 %v2034_v39, %v2033_v21  ;;  %v2036_v4 = vpop.f32.mrb[2].mxu0  ;;  %v1371_v39 = vld [vmem:[%s3117_s6 + $0x18] sm:$0xff] }
 0x3a2   : > { %v2037_v23 = vpop.f32.mrb[3].mxu0 }
 0x3a3   : > { %v2038_v7 = vadd.f32 %v2037_v23, %v2036_v4  ;;  %v1579_v43 = vadd.f32 %v2035_v22, %v1368_v28 }
 0x3a5   : > { %v1582_v12 = vadd.f32 %v2038_v7, %v1369_v6 }
 0x3a7   : > { %v2039_v26 = vpop.f32.mrb[4].mxu0 }
 0x3a8   : > { %v2040_v48 = vpop.f32.mrb[5].mxu0 }
 0x3a9   : > { %v2041_v29 = vadd.f32 %v2040_v48, %v2039_v26  ;;  %v2042_v30 = vpop.f32.mrb[6].mxu0 }
 0x3aa   : > { %v2043_v31 = vpop.f32.mrb[7].mxu0 }
 0x3ab   : > { %v2044_v32 = vadd.f32 %v2043_v31, %v2042_v30  ;;  %v1587_v22 = vadd.f32 %v2041_v29, %v1370_v17  ;;  %v1373_v29 = vld [vmem:[%s3117_s6 + $0x28] sm:$0xff] }
 0x3ad   : > { %v1590_v30 = vadd.f32 %v2044_v32, %v1371_v39 }
 0x3af   : > { %v2045_v59 = vpop.f32.mrb[8].mxu0 }
 0x3b0   : > { %v2046_v33 = vpop.f32.mrb[9].mxu0 }
 0x3b1   : > { %v3004_v46 = vadd.f32 %v2046_v33, %v2045_v59  ;;  %v2048_v5 = vpop.f32.mrb[10].mxu0 }
 0x3b2   : > { %v2049_v34 = vpop.f32.mrb[11].mxu0 }
 0x3b3   : > { %v3006_v35 = vadd.f32 %v2049_v34, %v2048_v5  ;;  %v1372_v5 = vld [vmem:[%s3117_s6 + $0x20] sm:$0xff] }
 0x3b4   : > { %v1595_v32 = vadd.f32 %v3004_v46, %v1372_v5  ;;  %v1375_v46 = vld [vmem:[%s3117_s6 + $0x38] sm:$0xff] }
 0x3b7   : > { %v2051_v8 = vpop.f32.mrb[12].mxu0 }
 0x3b8   : > { %v2052_v57 = vpop.f32.mrb[13].mxu0 }
 0x3b9   : > { %v3008_v36 = vadd.f32 %v2052_v57, %v2051_v8  ;;  %v2054_v37 = vpop.f32.mrb[14].mxu0 }
 0x3ba   : > { %v2055_v38 = vpop.f32.mrb[15].mxu0 }
 0x3bb   : > { %v3010_v40 = vadd.f32 %v2055_v38, %v2054_v37 }
 0x3bd   : > { %v1606_v28 = vadd.f32 %v3010_v40, %v1375_v46 }
 0x3bf   : > { %v2057_v42 = vpop.f32.mrb[16].mxu0 }
 0x3c0   : > { %v2058_v44 = vpop.f32.mrb[17].mxu0 }
 0x3c1   : > { %v3012_v45 = vadd.f32 %v2058_v44, %v2057_v42  ;;  %v2060_v3 = vpop.f32.mrb[18].mxu0 }
 0x3c2   : > { %v2061_v47 = vpop.f32.mrb[19].mxu0 }
 0x3c3   : > { %v3014_v49 = vadd.f32 %v2061_v47, %v2060_v3  ;;  %v1598_v47 = vadd.f32 %v3006_v35, %v1373_v29 }
 0x3c7   : > { %v2063_v50 = vpop.f32.mrb[20].mxu0 }
 0x3c8   : > { %v2064_v51 = vpop.f32.mrb[21].mxu0 }
 0x3c9   : > { %v3016_v52 = vadd.f32 %v2064_v51, %v2063_v50  ;;  %v2066_v16 = vpop.f32.mrb[22].mxu0 }
 0x3ca   : > { %v2067_v0 = vpop.f32.mrb[23].mxu0 }
 0x3cb   : > { %v3018_v53 = vadd.f32 %v2067_v0, %v2066_v16  ;;  %v1374_v0 = vld [vmem:[%s3117_s6 + $0x30] sm:$0xff] }
 0x3cc   : > { %v1603_v35 = vadd.f32 %v3008_v36, %v1374_v0  ;;  %v1377_v36 = vld [vmem:[%s3117_s6 + $0x48] sm:$0xff] }
 0x3cf   : > { %v2069_v54 = vpop.f32.mrb[24].mxu0 }
 0x3d0   : > { %v2070_v55 = vpop.f32.mrb[25].mxu0 }
 0x3d1   : > { %v3020_v27 = vadd.f32 %v2070_v55, %v2069_v54  ;;  %v2072_v56 = vpop.f32.mrb[26].mxu0 }
 0x3d2   : > { %v2073_v58 = vpop.f32.mrb[27].mxu0 }
 0x3d3   : > { %v3022_v60 = vadd.f32 %v2073_v58, %v2072_v56 }
 0x3d7   : > { %v2075_v61 = vpop.f32.mrb[28].mxu0 }
 0x3d8   : > { %v2076_v62 = vpop.f32.mrb[29].mxu0 }
 0x3d9   : > { %v3024_v24 = vadd.f32 %v2076_v62, %v2075_v61  ;;  %v2078_v63 = vpop.f32.mrb[30].mxu0 }
 0x3da   : > { %v2079_v1 = vpop.f32.mrb[31].mxu0 }
 0x3db   : > { %v3026_v2 = vadd.f32 %v2079_v1, %v2078_v63 }
 0x3df   : > { %v2097_v25 = vpop.f32.mrb[32].mxu0 }
 0x3e0   : > { %v2098_v18 = vpop.f32.mrb[33].mxu0 }
 0x3e1   : > { %v2099_v9 = vadd.f32 %v2098_v18, %v2097_v25  ;;  %v2100_v10 = vpop.f32.mrb[34].mxu0 }
 0x3e2   : > { %v2101_v11 = vpop.f32.mrb[35].mxu0 }
 0x3e3   : > { %v1676_v13 = vadd.f32 %v2099_v9, %v1579_v43  ;;  %v2102_v41 = vadd.f32 %v2101_v11, %v2100_v10  ;;  %v1376_v43 = vld [vmem:[%s3117_s6 + $0x40] sm:$0xff] }
 0x3e4   : > { %v1611_v40 = vadd.f32 %v3012_v45, %v1376_v43  ;;  %v1379_v45 = vld [vmem:[%s3117_s6 + $0x58] sm:$0xff] }
 0x3e5   : > { %v1679_v15 = vadd.f32 %v2102_v41, %v1582_v12  ;;  %v1738_v19 = vmax.f32 %v1676_v13, 0.0 }
 0x3e7   : > { %v1739_v20 = vmax.f32 %v1679_v15, 0.0  ;;  %v2103_v21 = vpop.f32.mrb[36].mxu0 }
 0x3e8   : > { %v2104_v4 = vpop.f32.mrb[37].mxu0 }
 0x3e9   : > { %v1755_v23 = vpack.c.bf16 %v1739_v20, %v1738_v19  ;;  %v2105_v26 = vadd.f32 %v2104_v4, %v2103_v21  ;;  %v2106_v48 = vpop.f32.mrb[38].mxu0  ;;  %v1614_v19 = vadd.f32 %v3014_v49, %v1377_v36  ;;  %v1378_v4 = vld [vmem:[%s3117_s6 + $0x50] sm:$0xff] }
 0x3ea   : > { %v2107_v7 = vpop.f32.mrb[39].mxu0  ;;  %v1619_v49 = vadd.f32 %v3016_v52, %v1378_v4  ;;  %v1381_v52 = vld [vmem:[%s3117_s6 + $0x68] sm:$0xff] }
 0x3eb   : > { %v1684_v31 = vadd.f32 %v2105_v26, %v1587_v22  ;;  %v2108_v59 = vadd.f32 %v2107_v7, %v2106_v48  ;;  %2231 = vmatpush3.bf16.msra.mxu1 %v1755_v23 }
 0x3ec   : > { %2232 = vmatprep.subr.bf16.mxu1 %v2406_v14 }
 0x3ed   : > { %v1687_v33 = vadd.f32 %v2108_v59, %v1590_v30  ;;  %v1740_v34 = vmax.f32 %v1684_v31, 0.0 }
 0x3ef   : > { %v1741_v8 = vmax.f32 %v1687_v33, 0.0  ;;  %v2109_v57 = vpop.f32.mrb[40].mxu0  ;;  %v1622_v33 = vadd.f32 %v3018_v53, %v1379_v45 }
 0x3f0   : > { %v2110_v37 = vpop.f32.mrb[41].mxu0 }
 0x3f1   : > { %v1756_v38 = vpack.c.bf16 %v1741_v8, %v1740_v34  ;;  %v2111_v42 = vadd.f32 %v2110_v37, %v2109_v57  ;;  %v2112_v44 = vpop.f32.mrb[42].mxu0  ;;  %v1380_v57 = vld [vmem:[%s3117_s6 + $0x60] sm:$0xff] }
 0x3f2   : > { %v2113_v3 = vpop.f32.mrb[43].mxu0  ;;  %v1627_v53 = vadd.f32 %v3020_v27, %v1380_v57  ;;  %v1383_v27 = vld [vmem:[%s3117_s6 + $0x78] sm:$0xff] }
 0x3f3   : > { %v1692_v50 = vadd.f32 %v2111_v42, %v1595_v32  ;;  %v2114_v51 = vadd.f32 %v2113_v3, %v2112_v44  ;;  %2233 = vmatpush3.bf16.msra.mxu1 %v1756_v38 }
 0x3f4   : > { %2234 = vmatprep.subr.bf16.mxu1 %v2406_v14 }
 0x3f5   : > { %v1695_v16 = vadd.f32 %v2114_v51, %v1598_v47  ;;  %v1742_v54 = vmax.f32 %v1692_v50, 0.0  ;;  %v1630_v50 = vadd.f32 %v3022_v60, %v1381_v52 }
 0x3f7   : > { %v1743_v55 = vmax.f32 %v1695_v16, 0.0  ;;  %v2115_v56 = vpop.f32.mrb[44].mxu0 }
 0x3f8   : > { %v2116_v58 = vpop.f32.mrb[45].mxu0 }
 0x3f9   : > { %v1757_v61 = vpack.c.bf16 %v1743_v55, %v1742_v54  ;;  %v2117_v62 = vadd.f32 %v2116_v58, %v2115_v56  ;;  %v2118_v63 = vpop.f32.mrb[46].mxu0  ;;  %v1382_v54 = vld [vmem:[%s3117_s6 + $0x70] sm:$0xff] }
 0x3fa   : > { %v2119_v1 = vpop.f32.mrb[47].mxu0  ;;  %v1635_v60 = vadd.f32 %v3024_v24, %v1382_v54  ;;  %v1754_v24 = vld [vmem:[%s3118_s7] sm:$0x1] }
 0x3fb   : > { %v1700_v25 = vadd.f32 %v2117_v62, %v1603_v35  ;;  %v2120_v6 = vadd.f32 %v2119_v1, %v2118_v63  ;;  %2235 = vmatpush3.bf16.msra.mxu1 %v1757_v61  ;;  %v1638_v1 = vadd.f32 %v3026_v2, %v1383_v27 }
 0x3fc   : > { %2236 = vmatprep.subr.bf16.mxu1 %v2406_v14 }
 0x3fd   : > { %v1703_v18 = vadd.f32 %v2120_v6, %v1606_v28  ;;  %v1744_v9 = vmax.f32 %v1700_v25, 0.0 }
 0x3ff   : > { %v1745_v10 = vmax.f32 %v1703_v18, 0.0  ;;  %v2121_v11 = vpop.f32.mrb[48].mxu0 }
 0x400   : > { %v2122_v12 = vpop.f32.mrb[49].mxu0 }
 0x401   : > { %v1758_v13 = vpack.c.bf16 %v1745_v10, %v1744_v9  ;;  %v2123_v41 = vadd.f32 %v2122_v12, %v2121_v11  ;;  %v2124_v15 = vpop.f32.mrb[50].mxu0  ;;  %v1763_v10 = vld [vmem:[#allocation3] sm:$0x1] }
 0x402   : > { %v2125_v17 = vpop.f32.mrb[51].mxu0 }
 0x403   : > { %v1708_v20 = vadd.f32 %v2123_v41, %v1611_v40  ;;  %v2126_v21 = vadd.f32 %v2125_v17, %v2124_v15  ;;  %2237 = vmatpush3.bf16.msra.mxu1 %v1758_v13 }
 0x404   : > { %2238 = vmatprep.subr.bf16.mxu1 %v2406_v14 }
 0x405   : > { %v1711_v39 = vadd.f32 %v2126_v21, %v1614_v19  ;;  %v1746_v22 = vmax.f32 %v1708_v20, 0.0 }
 0x407   : > { %v1747_v23 = vmax.f32 %v1711_v39, 0.0  ;;  %v2127_v26 = vpop.f32.mrb[52].mxu0 }
 0x408   : > { %v2128_v48 = vpop.f32.mrb[53].mxu0 }
 0x409   : > { %v1759_v7 = vpack.c.bf16 %v1747_v23, %v1746_v22  ;;  %v2129_v30 = vadd.f32 %v2128_v48, %v2127_v26  ;;  %v2130_v31 = vpop.f32.mrb[54].mxu0 }
 0x40a   : > { %v2131_v59 = vpop.f32.mrb[55].mxu0 }
 0x40b   : > { %v1716_v5 = vadd.f32 %v2129_v30, %v1619_v49  ;;  %v2132_v34 = vadd.f32 %v2131_v59, %v2130_v31  ;;  %2239 = vmatpush3.bf16.msra.mxu1 %v1759_v7 }
 0x40c   : > { %2240 = vmatprep.subr.bf16.mxu1 %v2406_v14 }
 0x40d   : > { %v1719_v8 = vadd.f32 %v2132_v34, %v1622_v33  ;;  %v1748_v29 = vmax.f32 %v1716_v5, 0.0 }
 0x40f   : > { %v1749_v37 = vmax.f32 %v1719_v8, 0.0  ;;  %v2133_v32 = vpop.f32.mrb[56].mxu0 }
 0x410   : > { %v2134_v38 = vpop.f32.mrb[57].mxu0 }
 0x411   : > { %v1760_v42 = vpack.c.bf16 %v1749_v37, %v1748_v29  ;;  %v2135_v44 = vadd.f32 %v2134_v38, %v2133_v32  ;;  %v2136_v3 = vpop.f32.mrb[58].mxu0 }
 0x412   : > { %v2137_v47 = vpop.f32.mrb[59].mxu0 }
 0x413   : > { %v1724_v51 = vadd.f32 %v2135_v44, %v1627_v53  ;;  %v2138_v16 = vadd.f32 %v2137_v47, %v2136_v3  ;;  %2241 = vmatpush3.bf16.msra.mxu1 %v1760_v42 }
 0x414   : > { %2242 = vmatprep.subr.bf16.mxu1 %v2406_v14 }
 0x415   : > { %v1727_v0 = vadd.f32 %v2138_v16, %v1630_v50  ;;  %v1750_v55 = vmax.f32 %v1724_v51, 0.0 }
 0x417   : > { %v1751_v56 = vmax.f32 %v1727_v0, 0.0  ;;  %v2139_v46 = vpop.f32.mrb[60].mxu0 }
 0x418   : > { %v2140_v58 = vpop.f32.mrb[61].mxu0 }
 0x419   : > { %v1761_v35 = vpack.c.bf16 %v1751_v56, %v1750_v55  ;;  %v2141_v61 = vadd.f32 %v2140_v58, %v2139_v46  ;;  %v2142_v62 = vpop.f32.mrb[62].mxu0 }
 0x41a   : > { %v2143_v63 = vpop.f32.mrb[63].mxu0 }
 0x41b   : > { %v1732_v28 = vadd.f32 %v2141_v61, %v1635_v60  ;;  %v2144_v25 = vadd.f32 %v2143_v63, %v2142_v62  ;;  %2243 = vmatpush3.bf16.msra.mxu1 %v1761_v35 }
 0x41c   : > { %2244 = vmatprep.subr.bf16.mxu1 %v2406_v14 }
 0x41d   : > { %v1735_v6 = vadd.f32 %v2144_v25, %v1638_v1  ;;  %v1752_v18 = vmax.f32 %v1732_v28, 0.0 }
 0x41f   : > { %v1753_v43 = vmax.f32 %v1735_v6, 0.0 }
 0x421   : > { %v1762_v9 = vpack.c.bf16 %v1753_v43, %v1752_v18 }
 0x423   : > { %2245 = vmatpush3.bf16.msra.mxu1 %v1762_v9 }
 0x426   : > { %2247 = vmatmul.mubr.bf16.vlgmr.msra.gmra.mrb[68].mxu1 %v1754_v24 }
 0x4f9   : > { %v1798_v2 = vpop.f32.mrb[68].mxu1 }
 0x4fa   : > { %v1799_v11 = vadd.f32 %v1798_v2, %v1763_v10  ;;  %v2248_v36 = vpop.f32.mrb[69].mxu1 }
 0x4fb   : > { %v1801_v14 = vpop.f32.mrb[70].mxu1 }
 0x4fc   : > { %1805 = vst.msk [vmem:[%s353_s16] sm:$0x1] %vm1804_vm6, %v1799_v11  ;;  %v2249_v12 = vpop.f32.mrb[71].mxu1 }
 0x4fd PF: > { %s21_s13 = sadd.s32 1, %s2402_s13   ;;  %s3121_s11 = smov %s2398_s12 }
 0x4fe   : > { %p18_p5 = scmp.ge.s32.totalorder %s21_s13, 4   ;;  %s3122_s12 = smov %s3124_s8 }
 0x500   :  { %20 = sbr.rel (!%p18_p5) target bundleno = 3 (0x3), region = 94 }

</bundles_post_ra>
